<compile_context>
chip_gen: v7x
topology: tpu7x:2x2x1
jax: 0.10.0
libtpu: 0.0.40
codegen_flags: <defaults>
</compile_context>

<pallas_src>
import jax
import jax.numpy as jnp
from jax.experimental import pallas as pl
from jax.experimental.pallas import tpu as pltpu


def _round_up(x: int, m: int) -> int:
    return (x + m - 1) // m * m


def _cdiv(a: int, b: int) -> int:
    return (a + b - 1) // b


# -----------------------------------------------------------------------------
# Kernel
# -----------------------------------------------------------------------------
def vae_kernel(
    x_ref, eps_ref,
    we1_ref, be1_ref, wml_ref, bml_ref,
    wd1_ref, bd1_ref, wd2_ref, bd2_ref,
    xrec_ref, mulv_ref,
):
    cdt = we1_ref.dtype                      # MXU compute dtype (bf16)
    x = x_ref[...].astype(cdt)               # [TB, Dp] cast in-kernel (hidden by MXU)
    eps = eps_ref[...]                       # [TB, Lp] f32

    # ---- encoder backbone: h = relu(x @ We1 + be1) ----
    h = jnp.dot(x, we1_ref[...], preferred_element_type=jnp.float32) + be1_ref[...]
    h = jnp.maximum(h, 0.0)

    # ---- fused mu|logvar projection: one [Hp, 2*Lp] matmul ----
    ml = jnp.dot(h.astype(cdt), wml_ref[...],
                 preferred_element_type=jnp.float32) + bml_ref[...]
    lp = mulv_ref.shape[-1] // 2             # 128-lane-aligned split point
    mu = ml[:, :lp]
    logvar = ml[:, lp:]

    # ---- reparameterize (f32 elementwise): z = mu + eps * exp(0.5 * logvar) ----
    z = mu + eps * jnp.exp(0.5 * logvar)

    # ---- decoder backbone ----
    hd = jnp.dot(z.astype(cdt), wd1_ref[...],
                 preferred_element_type=jnp.float32) + bd1_ref[...]
    hd = jnp.maximum(hd, 0.0)
    x_recon = jnp.dot(hd.astype(cdt), wd2_ref[...],
                      preferred_element_type=jnp.float32) + bd2_ref[...]

    xrec_ref[...] = x_recon.astype(xrec_ref.dtype)
    mulv_ref[...] = ml.astype(mulv_ref.dtype)   # single fused mu|logvar store


# -----------------------------------------------------------------------------
# Wrapper
# -----------------------------------------------------------------------------
def _derive_batch_tile(B, Dp, Hp, Lp, x_itemsize, out_itemsize, weight_bytes,
                       vmem_budget, max_batch_tile, min_tiles):
    """Pick (TB, n_tiles) so double-buffered activation tiles fit the VMEM budget
    with single-buffered weights, TB is a multiple of 16, padding is minimal,
    and (when the batch allows it) at least `min_tiles` grid steps exist."""
    # Per-row VMEM cost (bytes): double-buffered inputs + outputs + f32
    # intermediates + bf16 MXU operand copies (rough upper bound).
    row_bytes = (
        2 * (Dp * x_itemsize + Lp * 4)          # x, eps tiles (double-buffered)
        + 2 * (Dp + 2 * Lp) * out_itemsize      # x_recon, mu|logvar (double-buffered)
        + (2 * Hp + 4 * Lp + Dp) * 4            # h, ml, z, hd, x_recon in f32
        + (Dp + 2 * Hp + Lp) * 2                # bf16 casts feeding the MXU
    )
    avail = vmem_budget - weight_bytes - (2 << 20)      # headroom
    tb_max = (max(avail, 16 * row_bytes) // row_bytes) // 16 * 16
    tb_max = max(16, min(max_batch_tile, tb_max))

    n = _cdiv(B, tb_max)
    if B >= min_tiles * 16:                     # enough rows to feed 2 TCs (v7x)
        n = max(n, min_tiles)
    TB = _round_up(_cdiv(B, n), 16)
    return TB, n


def _make_specs(TB, Dp, Hp, Lp, single_buffer_weights):
    def batched(shape):
        return pl.BlockSpec(shape, lambda i: (i, 0))

    if single_buffer_weights:
        def resident(shape):
            # Constant index_map -> never re-DMA'd; 1 buffer halves weight VMEM.
            return pl.BlockSpec(shape, lambda i: (0, 0),
                                pipeline_mode=pl.Buffered(1))
    else:
        def resident(shape):
            return pl.BlockSpec(shape, lambda i: (0, 0))

    in_specs = [
        batched((TB, Dp)),            # x
        batched((TB, Lp)),            # eps
        resident((Dp, Hp)),           # We1
        resident((1, Hp)),            # be1
        resident((Hp, 2 * Lp)),       # Wmu|Wlv fused
        resident((1, 2 * Lp)),        # bmu|blv fused
        resident((Lp, Hp)),           # Wd1
        resident((1, Hp)),            # bd1
        resident((Hp, Dp)),           # Wd2
        resident((1, Dp)),            # bd2
    ]
    out_specs = (
        batched((TB, Dp)),            # x_recon
        batched((TB, 2 * Lp)),        # mu|logvar fused
    )
    return in_specs, out_specs


def vae_forward(x, eps, params, *, compute_dtype=jnp.bfloat16,
                out_dtype=jnp.float32, max_batch_tile=1024,
                vmem_budget=48 * 1024 * 1024, min_tiles=2):
    B, D = x.shape
    H = params["we1"].shape[1]
    L = params["wmu"].shape[1]

    # Lane-dense padded dims (multiples of 128).
    Dp = _round_up(D, 128)
    Hp = _round_up(H, 128)
    Lp = _round_up(L, 128)

    weight_bytes = (
        (Dp * Hp + Hp * 2 * Lp + Lp * Hp + Hp * Dp) * jnp.dtype(compute_dtype).itemsize
        + (2 * Hp + 2 * Lp + Dp) * 4
    )
    x_itemsize = jnp.dtype(x.dtype).itemsize
    out_itemsize = jnp.dtype(out_dtype).itemsize

    TB, n_tiles = _derive_batch_tile(B, Dp, Hp, Lp, x_itemsize, out_itemsize,
                                     weight_bytes, vmem_budget,
                                     max_batch_tile, min_tiles)
    Bp = n_tiles * TB

    def pad2(w, r, c, dtype):
        w = w.astype(dtype) if w.dtype != dtype else w
        if w.shape == (r, c):
            return w
        return jnp.pad(w, ((0, r - w.shape[0]), (0, c - w.shape[1])))

    # Pad + pack weights (zero padding is exact: padded lanes/rows contribute 0).
    we1 = pad2(params["we1"], Dp, Hp, compute_dtype)
    be1 = pad2(params["be1"], 1, Hp, jnp.float32)
    wml = jnp.concatenate(
        [pad2(params["wmu"], Hp, Lp, compute_dtype),
         pad2(params["wlv"], Hp, Lp, compute_dtype)], axis=1)
    bml = jnp.concatenate(
        [pad2(params["bmu"], 1, Lp, jnp.float32),
         pad2(params["blv"], 1, Lp, jnp.float32)], axis=1)
    wd1 = pad2(params["wd1"], Lp, Hp, compute_dtype)
    bd1 = pad2(params["bd1"], 1, Hp, jnp.float32)
    wd2 = pad2(params["wd2"], Hp, Dp, compute_dtype)
    bd2 = pad2(params["bd2"], 1, Dp, jnp.float32)

    # x stays in its original dtype (cast to bf16 inside the kernel); pad only
    # if actually misaligned.
    xp = x if (Bp == B and Dp == D) else jnp.pad(x, ((0, Bp - B), (0, Dp - D)))
    epsp = eps.astype(jnp.float32) if eps.dtype != jnp.float32 else eps
    if not (Bp == B and Lp == L):
        epsp = jnp.pad(epsp, ((0, Bp - B), (0, Lp - L)))

    # Advisory cost estimate for XLA's scheduler.
    flops = 2 * Bp * (Dp * Hp + Hp * 2 * Lp + Lp * Hp + Hp * Dp)
    bytes_accessed = (
        Bp * Dp * x_itemsize + Bp * Lp * 4          # x, eps in
        + weight_bytes                              # weights + biases
        + Bp * (Dp + 2 * Lp) * out_itemsize         # x_recon, mu|logvar out
    )

    def run(single_buffer_weights):
        in_specs, out_specs = _make_specs(TB, Dp, Hp, Lp, single_buffer_weights)
        return pl.pallas_call(
            vae_kernel,
            out_shape=(
                jax.ShapeDtypeStruct((Bp, Dp), out_dtype),
                jax.ShapeDtypeStruct((Bp, 2 * Lp), out_dtype),
            ),
            grid_spec=pltpu.PrefetchScalarGridSpec(
                num_scalar_prefetch=0,
                grid=(n_tiles,),
                in_specs=in_specs,
                out_specs=out_specs,
            ),
            compiler_params=pltpu.CompilerParams(
                dimension_semantics=("parallel",),
                vmem_limit_bytes=vmem_budget,
            ),
            cost_estimate=pl.CostEstimate(
                flops=flops, transcendentals=Bp * Lp,
                bytes_accessed=bytes_accessed),
        )(xp, epsp, we1, be1, wml, bml, wd1, bd1, wd2, bd2)

    try:
        x_recon, mulv = run(True)
    except Exception:
        # Fallback if this jax build rejects pl.Buffered(1) on the main pipeline.
        x_recon, mulv = run(False)

    # Strip padding; split fused mu|logvar in the wrapper (cheap slices on HBM).
    mu = mulv[:B, :L]
    logvar = mulv[:B, Lp:Lp + L]
    return x_recon[:B, :D], mu, logvar


# -----------------------------------------------------------------------------
# Params / reference
# -----------------------------------------------------------------------------
def init_params(key, input_dim, hidden_dim, latent_dim):
    ks = jax.random.split(key, 6)
    scale = 0.1
    return {
        "we1": scale * jax.random.normal(ks[0], (input_dim, hidden_dim), jnp.float32),
        "be1": jnp.zeros((1, hidden_dim), jnp.float32),
        "wmu": scale * jax.random.normal(ks[1], (hidden_dim, latent_dim), jnp.float32),
        "bmu": jnp.zeros((1, latent_dim), jnp.float32),
        "wlv": scale * jax.random.normal(ks[2], (hidden_dim, latent_dim), jnp.float32),
        "blv": jnp.zeros((1, latent_dim), jnp.float32),
        "wd1": scale * jax.random.normal(ks[3], (latent_dim, hidden_dim), jnp.float32),
        "bd1": jnp.zeros((1, hidden_dim), jnp.float32),
        "wd2": scale * jax.random.normal(ks[4], (hidden_dim, input_dim), jnp.float32),
        "bd2": jnp.zeros((1, input_dim), jnp.float32),
    }


def reference_forward(x, eps, p, compute_dtype=jnp.bfloat16):
    """Pure-JAX reference using the same bf16-in / f32-accumulate precision."""
    def mm(a, w):
        return jnp.dot(a.astype(compute_dtype), w.astype(compute_dtype),
                       preferred_element_type=jnp.float32)
    h = jnp.maximum(mm(x, p["we1"]) + p["be1"], 0.0)
    mu = mm(h, p["wmu"]) + p["bmu"]
    logvar = mm(h, p["wlv"]) + p["blv"]
    z = mu + eps * jnp.exp(0.5 * logvar)
    hd = jnp.maximum(mm(z, p["wd1"]) + p["bd1"], 0.0)
    x_recon = mm(hd, p["wd2"]) + p["bd2"]
    return x_recon, mu, logvar


if __name__ == "__main__":
    B, D, H, L = 8, 16, 32, 8   # batch, input_dim, hidden_dim, latent_dim

    key = jax.random.PRNGKey(0)
    k_x, k_eps, k_params = jax.random.split(key, 3)

    x = jax.random.normal(k_x, (B, D), jnp.float32)
    # eps ~ randn_like(std): drawn once in JAX and fed to the kernel for determinism.
    eps = jax.random.normal(k_eps, (B, L), jnp.float32)
    params = init_params(k_params, D, H, L)

    x_recon, mu, logvar = jax.block_until_ready(vae_forward(x, eps, params))

    # Correctness check against pure-JAX reference (same bf16 matmul precision).
    xr_ref, mu_ref, lv_ref = reference_forward(x, eps, params)
    assert jnp.allclose(x_recon, xr_ref, atol=1e-2, rtol=1e-2), "x_recon mismatch"
    assert jnp.allclose(mu, mu_ref, atol=1e-2, rtol=1e-2), "mu mismatch"
    assert jnp.allclose(logvar, lv_ref, atol=1e-2, rtol=1e-2), "logvar mismatch"

    print("KERNEL_OK")
</pallas_src>

<mosaic_0001>
module attributes {stable_mosaic.version = 11 : i64} {
  func.func @vae_kernel(%arg0: i32, %arg1: memref<16x128xf32, #tpu.memory_space<vmem>>, %arg2: memref<16x128xf32, #tpu.memory_space<vmem>>, %arg3: memref<128x128xbf16, #tpu.memory_space<vmem>>, %arg4: memref<1x128xf32, #tpu.memory_space<vmem>>, %arg5: memref<128x256xbf16, #tpu.memory_space<vmem>>, %arg6: memref<1x256xf32, #tpu.memory_space<vmem>>, %arg7: memref<128x128xbf16, #tpu.memory_space<vmem>>, %arg8: memref<1x128xf32, #tpu.memory_space<vmem>>, %arg9: memref<128x128xbf16, #tpu.memory_space<vmem>>, %arg10: memref<1x128xf32, #tpu.memory_space<vmem>>, %arg11: memref<16x128xf32, #tpu.memory_space<vmem>>, %arg12: memref<16x256xf32, #tpu.memory_space<vmem>>) attributes {dimension_semantics = [#tpu.dimension_semantics<parallel>], iteration_bounds = array<i64: 1>, scalar_prefetch = 0 : i64, scratch_operands = 0 : i64, tpu.core_type = #tpu.core_type<tc>, window_params = [{transform_indices = @transform_0, window_bounds = array<i64: 16, 128>}, {transform_indices = @transform_1, window_bounds = array<i64: 16, 128>}, {pipeline_mode = #tpu.pipeline_mode<synchronous>, transform_indices = @transform_2, window_bounds = array<i64: 128, 128>}, {pipeline_mode = #tpu.pipeline_mode<synchronous>, transform_indices = @transform_3, window_bounds = array<i64: 1, 128>}, {pipeline_mode = #tpu.pipeline_mode<synchronous>, transform_indices = @transform_4, window_bounds = array<i64: 128, 256>}, {pipeline_mode = #tpu.pipeline_mode<synchronous>, transform_indices = @transform_5, window_bounds = array<i64: 1, 256>}, {pipeline_mode = #tpu.pipeline_mode<synchronous>, transform_indices = @transform_6, window_bounds = array<i64: 128, 128>}, {pipeline_mode = #tpu.pipeline_mode<synchronous>, transform_indices = @transform_7, window_bounds = array<i64: 1, 128>}, {pipeline_mode = #tpu.pipeline_mode<synchronous>, transform_indices = @transform_8, window_bounds = array<i64: 128, 128>}, {pipeline_mode = #tpu.pipeline_mode<synchronous>, transform_indices = @transform_9, window_bounds = array<i64: 1, 128>}, {transform_indices = @transform_10, window_bounds = array<i64: 16, 128>}, {transform_indices = @transform_11, window_bounds = array<i64: 16, 256>}]} {
    %c0 = arith.constant 0 : index
    %c0_0 = arith.constant 0 : index
    %0 = vector.load %arg1[%c0, %c0_0] : memref<16x128xf32, #tpu.memory_space<vmem>>, vector<16x128xf32>
    %1 = arith.truncf %0 : vector<16x128xf32> to vector<16x128xbf16>
    %c0_1 = arith.constant 0 : index
    %c0_2 = arith.constant 0 : index
    %2 = vector.load %arg2[%c0_1, %c0_2] : memref<16x128xf32, #tpu.memory_space<vmem>>, vector<16x128xf32>
    %c0_3 = arith.constant 0 : index
    %c0_4 = arith.constant 0 : index
    %3 = vector.load %arg3[%c0_3, %c0_4] : memref<128x128xbf16, #tpu.memory_space<vmem>>, vector<128x128xbf16>
    %cst = arith.constant dense<0.000000e+00> : vector<16x128xf32>
    %4 = tpu.matmul %1, %3, %cst {dimension_numbers = #tpu.dot_dimension_numbers<[1], [0], [0], [1], [0, 0, 1, 1], [], []>} : vector<16x128xbf16>, vector<128x128xbf16>, vector<16x128xf32> -> vector<16x128xf32>
    %c0_5 = arith.constant 0 : index
    %c0_6 = arith.constant 0 : index
    %5 = vector.load %arg4[%c0_5, %c0_6] : memref<1x128xf32, #tpu.memory_space<vmem>>, vector<1x128xf32>
    %6 = vector.broadcast %5 : vector<1x128xf32> to vector<16x128xf32>
    %7 = arith.addf %4, %6 : vector<16x128xf32>
    %cst_7 = arith.constant 0.000000e+00 : f32
    %8 = vector.broadcast %cst_7 : f32 to vector<16x128xf32>
    %9 = arith.maximumf %7, %8 : vector<16x128xf32>
    %10 = arith.truncf %9 : vector<16x128xf32> to vector<16x128xbf16>
    %c0_8 = arith.constant 0 : index
    %c0_9 = arith.constant 0 : index
    %11 = vector.load %arg5[%c0_8, %c0_9] : memref<128x256xbf16, #tpu.memory_space<vmem>>, vector<128x256xbf16>
    %cst_10 = arith.constant dense<0.000000e+00> : vector<16x256xf32>
    %12 = tpu.matmul %10, %11, %cst_10 {dimension_numbers = #tpu.dot_dimension_numbers<[1], [0], [0], [1], [0, 0, 1, 1], [], []>} : vector<16x128xbf16>, vector<128x256xbf16>, vector<16x256xf32> -> vector<16x256xf32>
    %c0_11 = arith.constant 0 : index
    %c0_12 = arith.constant 0 : index
    %13 = vector.load %arg6[%c0_11, %c0_12] : memref<1x256xf32, #tpu.memory_space<vmem>>, vector<1x256xf32>
    %14 = vector.broadcast %13 : vector<1x256xf32> to vector<16x256xf32>
    %15 = arith.addf %12, %14 : vector<16x256xf32>
    %16 = vector.extract_strided_slice %15 {offsets = [0, 0], sizes = [16, 128], strides = [1, 1]} : vector<16x256xf32> to vector<16x128xf32>
    %17 = vector.extract_strided_slice %15 {offsets = [0, 128], sizes = [16, 128], strides = [1, 1]} : vector<16x256xf32> to vector<16x128xf32>
    %cst_13 = arith.constant 5.000000e-01 : f32
    %18 = vector.broadcast %cst_13 : f32 to vector<16x128xf32>
    %19 = arith.mulf %18, %17 : vector<16x128xf32>
    %20 = math.exp %19 : vector<16x128xf32>
    %21 = arith.mulf %2, %20 : vector<16x128xf32>
    %22 = arith.addf %16, %21 : vector<16x128xf32>
    %23 = arith.truncf %22 : vector<16x128xf32> to vector<16x128xbf16>
    %c0_14 = arith.constant 0 : index
    %c0_15 = arith.constant 0 : index
    %24 = vector.load %arg7[%c0_14, %c0_15] : memref<128x128xbf16, #tpu.memory_space<vmem>>, vector<128x128xbf16>
    %cst_16 = arith.constant dense<0.000000e+00> : vector<16x128xf32>
    %25 = tpu.matmul %23, %24, %cst_16 {dimension_numbers = #tpu.dot_dimension_numbers<[1], [0], [0], [1], [0, 0, 1, 1], [], []>} : vector<16x128xbf16>, vector<128x128xbf16>, vector<16x128xf32> -> vector<16x128xf32>
    %c0_17 = arith.constant 0 : index
    %c0_18 = arith.constant 0 : index
    %26 = vector.load %arg8[%c0_17, %c0_18] : memref<1x128xf32, #tpu.memory_space<vmem>>, vector<1x128xf32>
    %27 = vector.broadcast %26 : vector<1x128xf32> to vector<16x128xf32>
    %28 = arith.addf %25, %27 : vector<16x128xf32>
    %cst_19 = arith.constant 0.000000e+00 : f32
    %29 = vector.broadcast %cst_19 : f32 to vector<16x128xf32>
    %30 = arith.maximumf %28, %29 : vector<16x128xf32>
    %31 = arith.truncf %30 : vector<16x128xf32> to vector<16x128xbf16>
    %c0_20 = arith.constant 0 : index
    %c0_21 = arith.constant 0 : index
    %32 = vector.load %arg9[%c0_20, %c0_21] : memref<128x128xbf16, #tpu.memory_space<vmem>>, vector<128x128xbf16>
    %cst_22 = arith.constant dense<0.000000e+00> : vector<16x128xf32>
    %33 = tpu.matmul %31, %32, %cst_22 {dimension_numbers = #tpu.dot_dimension_numbers<[1], [0], [0], [1], [0, 0, 1, 1], [], []>} : vector<16x128xbf16>, vector<128x128xbf16>, vector<16x128xf32> -> vector<16x128xf32>
    %c0_23 = arith.constant 0 : index
    %c0_24 = arith.constant 0 : index
    %34 = vector.load %arg10[%c0_23, %c0_24] : memref<1x128xf32, #tpu.memory_space<vmem>>, vector<1x128xf32>
    %35 = vector.broadcast %34 : vector<1x128xf32> to vector<16x128xf32>
    %36 = arith.addf %33, %35 : vector<16x128xf32>
    %c0_25 = arith.constant 0 : index
    %c0_26 = arith.constant 0 : index
    %37 = vector.load %arg11[%c0_25, %c0_26] : memref<16x128xf32, #tpu.memory_space<vmem>>, vector<16x128xf32>
    tpu.vector_store %arg11[%c0_25, %c0_26], %36 {strides = array<i32>} : memref<16x128xf32, #tpu.memory_space<vmem>>, vector<16x128xf32>,
    %c0_27 = arith.constant 0 : index
    %c0_28 = arith.constant 0 : index
    %38 = vector.load %arg12[%c0_27, %c0_28] : memref<16x256xf32, #tpu.memory_space<vmem>>, vector<16x256xf32>
    tpu.vector_store %arg12[%c0_27, %c0_28], %15 {strides = array<i32>} : memref<16x256xf32, #tpu.memory_space<vmem>>, vector<16x256xf32>,
    return
  }
  func.func @transform_0(%arg0: i32) -> (i32, i32) {
    %c0_i32 = arith.constant 0 : i32
    %c0_i32_0 = arith.constant 0 : i32
    return %arg0, %c0_i32 : i32, i32
  }
  func.func @transform_1(%arg0: i32) -> (i32, i32) {
    %c0_i32 = arith.constant 0 : i32
    %c0_i32_0 = arith.constant 0 : i32
    return %arg0, %c0_i32 : i32, i32
  }
  func.func @transform_2(%arg0: i32) -> (i32, i32) {
    %c0_i32 = arith.constant 0 : i32
    %c0_i32_0 = arith.constant 0 : i32
    %c0_i32_1 = arith.constant 0 : i32
    return %c0_i32, %c0_i32_0 : i32, i32
  }
  func.func @transform_3(%arg0: i32) -> (i32, i32) {
    %c0_i32 = arith.constant 0 : i32
    %c0_i32_0 = arith.constant 0 : i32
    %c0_i32_1 = arith.constant 0 : i32
    return %c0_i32, %c0_i32_0 : i32, i32
  }
  func.func @transform_4(%arg0: i32) -> (i32, i32) {
    %c0_i32 = arith.constant 0 : i32
    %c0_i32_0 = arith.constant 0 : i32
    %c0_i32_1 = arith.constant 0 : i32
    return %c0_i32, %c0_i32_0 : i32, i32
  }
  func.func @transform_5(%arg0: i32) -> (i32, i32) {
    %c0_i32 = arith.constant 0 : i32
    %c0_i32_0 = arith.constant 0 : i32
    %c0_i32_1 = arith.constant 0 : i32
    return %c0_i32, %c0_i32_0 : i32, i32
  }
  func.func @transform_6(%arg0: i32) -> (i32, i32) {
    %c0_i32 = arith.constant 0 : i32
    %c0_i32_0 = arith.constant 0 : i32
    %c0_i32_1 = arith.constant 0 : i32
    return %c0_i32, %c0_i32_0 : i32, i32
  }
  func.func @transform_7(%arg0: i32) -> (i32, i32) {
    %c0_i32 = arith.constant 0 : i32
    %c0_i32_0 = arith.constant 0 : i32
    %c0_i32_1 = arith.constant 0 : i32
    return %c0_i32, %c0_i32_0 : i32, i32
  }
  func.func @transform_8(%arg0: i32) -> (i32, i32) {
    %c0_i32 = arith.constant 0 : i32
    %c0_i32_0 = arith.constant 0 : i32
    %c0_i32_1 = arith.constant 0 : i32
    return %c0_i32, %c0_i32_0 : i32, i32
  }
  func.func @transform_9(%arg0: i32) -> (i32, i32) {
    %c0_i32 = arith.constant 0 : i32
    %c0_i32_0 = arith.constant 0 : i32
    %c0_i32_1 = arith.constant 0 : i32
    return %c0_i32, %c0_i32_0 : i32, i32
  }
  func.func @transform_10(%arg0: i32) -> (i32, i32) {
    %c0_i32 = arith.constant 0 : i32
    %c0_i32_0 = arith.constant 0 : i32
    return %arg0, %c0_i32 : i32, i32
  }
  func.func @transform_11(%arg0: i32) -> (i32, i32) {
    %c0_i32 = arith.constant 0 : i32
    %c0_i32_0 = arith.constant 0 : i32
    return %arg0, %c0_i32 : i32, i32
  }
}

module attributes {stable_mosaic.version = 11 : i64} {
  func.func @vae_kernel(%arg0: i32, %arg1: memref<16x128xf32, #tpu.memory_space<vmem>>, %arg2: memref<16x128xf32, #tpu.memory_space<vmem>>, %arg3: memref<128x128xbf16, #tpu.memory_space<vmem>>, %arg4: memref<1x128xf32, #tpu.memory_space<vmem>>, %arg5: memref<128x256xbf16, #tpu.memory_space<vmem>>, %arg6: memref<1x256xf32, #tpu.memory_space<vmem>>, %arg7: memref<128x128xbf16, #tpu.memory_space<vmem>>, %arg8: memref<1x128xf32, #tpu.memory_space<vmem>>, %arg9: memref<128x128xbf16, #tpu.memory_space<vmem>>, %arg10: memref<1x128xf32, #tpu.memory_space<vmem>>, %arg11: memref<16x128xf32, #tpu.memory_space<vmem>>, %arg12: memref<16x256xf32, #tpu.memory_space<vmem>>) attributes {dimension_semantics = [#tpu.dimension_semantics<parallel>], iteration_bounds = array<i64: 1>, scalar_prefetch = 0 : i64, scratch_operands = 0 : i64, tpu.core_type = #tpu.core_type<tc>, window_params = [{transform_indices = @transform_0, window_bounds = array<i64: 16, 128>}, {transform_indices = @transform_1, window_bounds = array<i64: 16, 128>}, {pipeline_mode = #tpu.pipeline_mode<synchronous>, transform_indices = @transform_2, window_bounds = array<i64: 128, 128>}, {pipeline_mode = #tpu.pipeline_mode<synchronous>, transform_indices = @transform_3, window_bounds = array<i64: 1, 128>}, {pipeline_mode = #tpu.pipeline_mode<synchronous>, transform_indices = @transform_4, window_bounds = array<i64: 128, 256>}, {pipeline_mode = #tpu.pipeline_mode<synchronous>, transform_indices = @transform_5, window_bounds = array<i64: 1, 256>}, {pipeline_mode = #tpu.pipeline_mode<synchronous>, transform_indices = @transform_6, window_bounds = array<i64: 128, 128>}, {pipeline_mode = #tpu.pipeline_mode<synchronous>, transform_indices = @transform_7, window_bounds = array<i64: 1, 128>}, {pipeline_mode = #tpu.pipeline_mode<synchronous>, transform_indices = @transform_8, window_bounds = array<i64: 128, 128>}, {pipeline_mode = #tpu.pipeline_mode<synchronous>, transform_indices = @transform_9, window_bounds = array<i64: 1, 128>}, {transform_indices = @transform_10, window_bounds = array<i64: 16, 128>}, {transform_indices = @transform_11, window_bounds = array<i64: 16, 256>}]} {
    %c0 = arith.constant 0 : index
    %c0_0 = arith.constant 0 : index
    %0 = vector.load %arg1[%c0, %c0_0] : memref<16x128xf32, #tpu.memory_space<vmem>>, vector<16x128xf32>
    %1 = arith.truncf %0 : vector<16x128xf32> to vector<16x128xbf16>
    %c0_1 = arith.constant 0 : index
    %c0_2 = arith.constant 0 : index
    %2 = vector.load %arg2[%c0_1, %c0_2] : memref<16x128xf32, #tpu.memory_space<vmem>>, vector<16x128xf32>
    %c0_3 = arith.constant 0 : index
    %c0_4 = arith.constant 0 : index
    %3 = vector.load %arg3[%c0_3, %c0_4] : memref<128x128xbf16, #tpu.memory_space<vmem>>, vector<128x128xbf16>
    %cst = arith.constant dense<0.000000e+00> : vector<16x128xf32>
    %4 = tpu.matmul %1, %3, %cst {dimension_numbers = #tpu.dot_dimension_numbers<[1], [0], [0], [1], [0, 0, 1, 1], [], []>} : vector<16x128xbf16>, vector<128x128xbf16>, vector<16x128xf32> -> vector<16x128xf32>
    %c0_5 = arith.constant 0 : index
    %c0_6 = arith.constant 0 : index
    %5 = vector.load %arg4[%c0_5, %c0_6] : memref<1x128xf32, #tpu.memory_space<vmem>>, vector<1x128xf32>
    %6 = vector.broadcast %5 : vector<1x128xf32> to vector<16x128xf32>
    %7 = arith.addf %4, %6 : vector<16x128xf32>
    %cst_7 = arith.constant 0.000000e+00 : f32
    %8 = vector.broadcast %cst_7 : f32 to vector<16x128xf32>
    %9 = arith.maximumf %7, %8 : vector<16x128xf32>
    %10 = arith.truncf %9 : vector<16x128xf32> to vector<16x128xbf16>
    %c0_8 = arith.constant 0 : index
    %c0_9 = arith.constant 0 : index
    %11 = vector.load %arg5[%c0_8, %c0_9] : memref<128x256xbf16, #tpu.memory_space<vmem>>, vector<128x256xbf16>
    %cst_10 = arith.constant dense<0.000000e+00> : vector<16x256xf32>
    %12 = tpu.matmul %10, %11, %cst_10 {dimension_numbers = #tpu.dot_dimension_numbers<[1], [0], [0], [1], [0, 0, 1, 1], [], []>} : vector<16x128xbf16>, vector<128x256xbf16>, vector<16x256xf32> -> vector<16x256xf32>
    %c0_11 = arith.constant 0 : index
    %c0_12 = arith.constant 0 : index
    %13 = vector.load %arg6[%c0_11, %c0_12] : memref<1x256xf32, #tpu.memory_space<vmem>>, vector<1x256xf32>
    %14 = vector.broadcast %13 : vector<1x256xf32> to vector<16x256xf32>
    %15 = arith.addf %12, %14 : vector<16x256xf32>
    %16 = vector.extract_strided_slice %15 {offsets = [0, 0], sizes = [16, 128], strides = [1, 1]} : vector<16x256xf32> to vector<16x128xf32>
    %17 = vector.extract_strided_slice %15 {offsets = [0, 128], sizes = [16, 128], strides = [1, 1]} : vector<16x256xf32> to vector<16x128xf32>
    %cst_13 = arith.constant 5.000000e-01 : f32
    %18 = vector.broadcast %cst_13 : f32 to vector<16x128xf32>
    %19 = arith.mulf %18, %17 : vector<16x128xf32>
    %20 = math.exp %19 : vector<16x128xf32>
    %21 = arith.mulf %2, %20 : vector<16x128xf32>
    %22 = arith.addf %16, %21 : vector<16x128xf32>
    %23 = arith.truncf %22 : vector<16x128xf32> to vector<16x128xbf16>
    %c0_14 = arith.constant 0 : index
    %c0_15 = arith.constant 0 : index
    %24 = vector.load %arg7[%c0_14, %c0_15] : memref<128x128xbf16, #tpu.memory_space<vmem>>, vector<128x128xbf16>
    %cst_16 = arith.constant dense<0.000000e+00> : vector<16x128xf32>
    %25 = tpu.matmul %23, %24, %cst_16 {dimension_numbers = #tpu.dot_dimension_numbers<[1], [0], [0], [1], [0, 0, 1, 1], [], []>} : vector<16x128xbf16>, vector<128x128xbf16>, vector<16x128xf32> -> vector<16x128xf32>
    %c0_17 = arith.constant 0 : index
    %c0_18 = arith.constant 0 : index
    %26 = vector.load %arg8[%c0_17, %c0_18] : memref<1x128xf32, #tpu.memory_space<vmem>>, vector<1x128xf32>
    %27 = vector.broadcast %26 : vector<1x128xf32> to vector<16x128xf32>
    %28 = arith.addf %25, %27 : vector<16x128xf32>
    %cst_19 = arith.constant 0.000000e+00 : f32
    %29 = vector.broadcast %cst_19 : f32 to vector<16x128xf32>
    %30 = arith.maximumf %28, %29 : vector<16x128xf32>
    %31 = arith.truncf %30 : vector<16x128xf32> to vector<16x128xbf16>
    %c0_20 = arith.constant 0 : index
    %c0_21 = arith.constant 0 : index
    %32 = vector.load %arg9[%c0_20, %c0_21] : memref<128x128xbf16, #tpu.memory_space<vmem>>, vector<128x128xbf16>
    %cst_22 = arith.constant dense<0.000000e+00> : vector<16x128xf32>
    %33 = tpu.matmul %31, %32, %cst_22 {dimension_numbers = #tpu.dot_dimension_numbers<[1], [0], [0], [1], [0, 0, 1, 1], [], []>} : vector<16x128xbf16>, vector<128x128xbf16>, vector<16x128xf32> -> vector<16x128xf32>
    %c0_23 = arith.constant 0 : index
    %c0_24 = arith.constant 0 : index
    %34 = vector.load %arg10[%c0_23, %c0_24] : memref<1x128xf32, #tpu.memory_space<vmem>>, vector<1x128xf32>
    %35 = vector.broadcast %34 : vector<1x128xf32> to vector<16x128xf32>
    %36 = arith.addf %33, %35 : vector<16x128xf32>
    %c0_25 = arith.constant 0 : index
    %c0_26 = arith.constant 0 : index
    %37 = vector.load %arg11[%c0_25, %c0_26] : memref<16x128xf32, #tpu.memory_space<vmem>>, vector<16x128xf32>
    tpu.vector_store %arg11[%c0_25, %c0_26], %36 {strides = array<i32>} : memref<16x128xf32, #tpu.memory_space<vmem>>, vector<16x128xf32>,
    %c0_27 = arith.constant 0 : index
    %c0_28 = arith.constant 0 : index
    %38 = vector.load %arg12[%c0_27, %c0_28] : memref<16x256xf32, #tpu.memory_space<vmem>>, vector<16x256xf32>
    tpu.vector_store %arg12[%c0_27, %c0_28], %15 {strides = array<i32>} : memref<16x256xf32, #tpu.memory_space<vmem>>, vector<16x256xf32>,
    return
  }
  func.func @transform_0(%arg0: i32) -> (i32, i32) {
    %c0_i32 = arith.constant 0 : i32
    %c0_i32_0 = arith.constant 0 : i32
    return %arg0, %c0_i32 : i32, i32
  }
  func.func @transform_1(%arg0: i32) -> (i32, i32) {
    %c0_i32 = arith.constant 0 : i32
    %c0_i32_0 = arith.constant 0 : i32
    return %arg0, %c0_i32 : i32, i32
  }
  func.func @transform_2(%arg0: i32) -> (i32, i32) {
    %c0_i32 = arith.constant 0 : i32
    %c0_i32_0 = arith.constant 0 : i32
    %c0_i32_1 = arith.constant 0 : i32
    return %c0_i32, %c0_i32_0 : i32, i32
  }
  func.func @transform_3(%arg0: i32) -> (i32, i32) {
    %c0_i32 = arith.constant 0 : i32
    %c0_i32_0 = arith.constant 0 : i32
    %c0_i32_1 = arith.constant 0 : i32
    return %c0_i32, %c0_i32_0 : i32, i32
  }
  func.func @transform_4(%arg0: i32) -> (i32, i32) {
    %c0_i32 = arith.constant 0 : i32
    %c0_i32_0 = arith.constant 0 : i32
    %c0_i32_1 = arith.constant 0 : i32
    return %c0_i32, %c0_i32_0 : i32, i32
  }
  func.func @transform_5(%arg0: i32) -> (i32, i32) {
    %c0_i32 = arith.constant 0 : i32
    %c0_i32_0 = arith.constant 0 : i32
    %c0_i32_1 = arith.constant 0 : i32
    return %c0_i32, %c0_i32_0 : i32, i32
  }
  func.func @transform_6(%arg0: i32) -> (i32, i32) {
    %c0_i32 = arith.constant 0 : i32
    %c0_i32_0 = arith.constant 0 : i32
    %c0_i32_1 = arith.constant 0 : i32
    return %c0_i32, %c0_i32_0 : i32, i32
  }
  func.func @transform_7(%arg0: i32) -> (i32, i32) {
    %c0_i32 = arith.constant 0 : i32
    %c0_i32_0 = arith.constant 0 : i32
    %c0_i32_1 = arith.constant 0 : i32
    return %c0_i32, %c0_i32_0 : i32, i32
  }
  func.func @transform_8(%arg0: i32) -> (i32, i32) {
    %c0_i32 = arith.constant 0 : i32
    %c0_i32_0 = arith.constant 0 : i32
    %c0_i32_1 = arith.constant 0 : i32
    return %c0_i32, %c0_i32_0 : i32, i32
  }
  func.func @transform_9(%arg0: i32) -> (i32, i32) {
    %c0_i32 = arith.constant 0 : i32
    %c0_i32_0 = arith.constant 0 : i32
    %c0_i32_1 = arith.constant 0 : i32
    return %c0_i32, %c0_i32_0 : i32, i32
  }
  func.func @transform_10(%arg0: i32) -> (i32, i32) {
    %c0_i32 = arith.constant 0 : i32
    %c0_i32_0 = arith.constant 0 : i32
    return %arg0, %c0_i32 : i32, i32
  }
  func.func @transform_11(%arg0: i32) -> (i32, i32) {
    %c0_i32 = arith.constant 0 : i32
    %c0_i32_0 = arith.constant 0 : i32
    return %arg0, %c0_i32 : i32, i32
  }
}

</mosaic_0001>

<bundles_post_ra>
// kernel: tpu_custom_call.1
= control target key start
LH: loop header
LB: loop body
LE: loop exit
PB: predicated region body
PF: predicated region fallthrough
CT: control target
= control target key end

     0   :  { %17 = vsyncpa [#allocation3], 0  ;;  %s1317_s0 = inlined_call_operand.hbm [shape: f32[16,128], index: 0, kind: input, shape index: {}]   ;;  %s1318_s1 = inlined_call_operand.hbm [shape: f32[16,128], index: 1, kind: input, shape index: {}]   ;;  %s1319_s2 = inlined_call_operand.hbm [shape: bf16[128,128], index: 2, kind: input, shape index: {}]   ;;  %s1320_s3 = inlined_call_operand.vmem [shape: f32[1,128], index: 3, kind: input, shape index: {}]   ;;  %s1321_s4 = inlined_call_operand.hbm [shape: bf16[128,256], index: 4, kind: input, shape index: {}]   ;;  %s1322_s5 = inlined_call_operand.vmem [shape: f32[1,256], index: 5, kind: input, shape index: {}]   ;;  %s1323_s6 = inlined_call_operand.hbm [shape: bf16[128,128], index: 6, kind: input, shape index: {}]   ;;  %s1324_s7 = inlined_call_operand.vmem [shape: f32[1,128], index: 7, kind: input, shape index: {}]   ;;  %s1325_s8 = inlined_call_operand.hbm [shape: bf16[128,128], index: 8, kind: input, shape index: {}]   ;;  %s1326_s9 = inlined_call_operand.vmem [shape: f32[1,128], index: 9, kind: input, shape index: {}]   ;;  %s1327_s10 = inlined_call_operand.hbm [shape: f32[16,128], index: 10, kind: output, shape index: {0}]   ;;  %s1328_s11 = inlined_call_operand.hbm [shape: f32[16,256], index: 11, kind: output, shape index: {1}]  }
   0x1   :  { %18 = vsyncpa [#allocation6], 0 }
   0x2   :  { %19 = vsyncpa [#allocation9], 0 }
   0x3   :  { %20 = vsyncpa [#allocation12], 0 }
   0x4   :  { %21 = vsyncpa [#allocation4], 0 }
   0x5   :  { %22 = vsyncpa [#allocation15], 0  ;;  %s1060_s17 = smov [#allocation5]   ;;  %s1061_s19 = smov [#allocation8]  }
   0x6   :  { %s40_s18 = sshll.u32 %s1060_s17, 4  ;;  %s66_s20 = sshll.u32 %s1061_s19, 4  ;;  %s41_s18 = int_to_ptr.vmem [resolvable:$true] %s40_s18  ;;  %s1137_s20 = int_to_ptr.vmem [resolvable:$true] %s66_s20 }
   0x7   :  { %s872_s23 = scalar_lea.hbm %s1318_s1, 256 }
   0x8   :  { %p873_p0 = scmp.ne.s32.totalorder %s1318_s1, %s872_s23  ;;  %p876_p1 = scmp.lt.u32.totalorder %s872_s23, %s1318_s1 }
   0xa   :  { %p878_p2 = pnand %p876_p1, %p873_p0 }
   0xc   :  { %881 = shalt.err (!%p878_p2)
}
   0xd   :  { %s882_s28 = scalar_lea.vmem %s41_s18, 256  ;;  %p887_p4 = scmp.lt.s32.totalorder %s41_s18, %s41_s18 }
   0xe   :  { %p883_p3 = scmp.ne.s32.totalorder %s41_s18, %s882_s28  ;;  %p888_p5 = scmp.lt.s32.totalorder %s882_s28, %s882_s28 }
  0x10   :  { %p889_p6 = por %p888_p5, %p887_p4 }
  0x12   :  { %p890_p7 = pnand %p889_p6, %p883_p3 }
  0x14   :  { %893 = shalt.err (!%p890_p7)
}
  0x15   :  { %s1062_s29 = smov 128   ;;  %s1063_s30 = smov 8  }
  0x16   :  { %46 = dma.hbm_to_vmem [thread:$0]  %s1318_s1, 256, %s41_s18, [#allocation6], %s1062_s29, %s1062_s29, %s1063_s30  }
  0x17   :  { %s894_s16 = scalar_lea.hbm %s1321_s4, 2048 }
  0x18   :  { %p895_p8 = scmp.ne.s32.totalorder %s1321_s4, %s894_s16  ;;  %p898_p9 = scmp.lt.u32.totalorder %s894_s16, %s1321_s4 }
  0x1a   :  { %p900_p10 = pnand %p898_p9, %p895_p8 }
  0x1c   :  { %903 = shalt.err (!%p900_p10)
}
  0x1d   :  { %s904_s23 = scalar_lea.vmem %s1137_s20, 2048  ;;  %p909_p12 = scmp.lt.s32.totalorder %s1137_s20, %s1137_s20 }
  0x1e   :  { %p905_p11 = scmp.ne.s32.totalorder %s1137_s20, %s904_s23  ;;  %p910_p13 = scmp.lt.s32.totalorder %s904_s23, %s904_s23 }
  0x20   :  { %p911_p0 = por %p910_p13, %p909_p12 }
  0x22   :  { %p912_p1 = pnand %p911_p0, %p905_p11 }
  0x24   :  { %915 = shalt.err (!%p912_p1)
}
  0x25   :  { %72 = dma.hbm_to_vmem [thread:$0]  %s1321_s4, 2048, %s1137_s20, [#allocation9], %s1062_s29, %s1062_s29, %s1063_s30  }
  0x26   :  { %s1064_s24 = smov [#allocation2]   ;;  %s1065_s26 = smov [#allocation7]  }
  0x27   :  { %s28_s25 = sshll.u32 %s1064_s24, 4  ;;  %s52_s27 = sshll.u32 %s1065_s26, 4  ;;  %s29_s25 = int_to_ptr.vmem [resolvable:$true] %s28_s25  ;;  %s1174_s27 = int_to_ptr.vmem [resolvable:$true] %s52_s27 }
  0x28   :  { %s916_s13 = scalar_lea.hbm %s1317_s0, 256 }
  0x29   :  { %p917_p2 = scmp.ne.s32.totalorder %s1317_s0, %s916_s13  ;;  %p920_p3 = scmp.lt.u32.totalorder %s916_s13, %s1317_s0 }
  0x2b   :  { %p922_p4 = pnand %p920_p3, %p917_p2 }
  0x2d   :  { %925 = shalt.err (!%p922_p4)
}
  0x2e   :  { %s926_s4 = scalar_lea.vmem %s29_s25, 256  ;;  %p931_p6 = scmp.lt.s32.totalorder %s29_s25, %s29_s25 }
  0x2f   :  { %p927_p5 = scmp.ne.s32.totalorder %s29_s25, %s926_s4  ;;  %p932_p7 = scmp.lt.s32.totalorder %s926_s4, %s926_s4 }
  0x31   :  { %p933_p8 = por %p932_p7, %p931_p6 }
  0x33   :  { %p934_p9 = pnand %p933_p8, %p927_p5 }
  0x35   :  { %937 = shalt.err (!%p934_p9)
}
  0x36   :  { %34 = dma.hbm_to_vmem [thread:$0]  %s1317_s0, 256, %s29_s25, [#allocation3], %s1062_s29, %s1062_s29, %s1063_s30  }
  0x37   :  { %s938_s23 = scalar_lea.hbm %s1319_s2, 1024 }
  0x38   :  { %p939_p10 = scmp.ne.s32.totalorder %s1319_s2, %s938_s23  ;;  %p942_p11 = scmp.lt.u32.totalorder %s938_s23, %s1319_s2 }
  0x3a   :  { %p944_p12 = pnand %p942_p11, %p939_p10 }
  0x3c   :  { %947 = shalt.err (!%p944_p12)
}
  0x3d   :  { %s948_s28 = scalar_lea.vmem %s1174_s27, 1024  ;;  %p953_p0 = scmp.lt.s32.totalorder %s1174_s27, %s1174_s27 }
  0x3e   :  { %p949_p13 = scmp.ne.s32.totalorder %s1174_s27, %s948_s28  ;;  %p954_p1 = scmp.lt.s32.totalorder %s948_s28, %s948_s28 }
  0x40   :  { %p955_p2 = por %p954_p1, %p953_p0 }
  0x42   :  { %p956_p3 = pnand %p955_p2, %p949_p13 }
  0x44   :  { %959 = shalt.err (!%p956_p3)
}
  0x45   :  { %s1066_s0 = smov 64   ;;  %s1067_s25 = smov 4  }
  0x46   :  { %58 = dma.hbm_to_vmem [thread:$0]  %s1319_s2, 1024, %s1174_s27, [#allocation6], %s1066_s0, %s1066_s0, %s1067_s25  }
  0x47   :  { %s1068_s14 = smov [#allocation10]   ;;  %s1069_s16 = smov [#allocation11]  }
  0x48   :  { %s80_s15 = sshll.u32 %s1068_s14, 4  ;;  %s94_s17 = sshll.u32 %s1069_s16, 4  ;;  %s81_s15 = int_to_ptr.vmem [resolvable:$true] %s80_s15  ;;  %s1211_s17 = int_to_ptr.vmem [resolvable:$true] %s94_s17 }
  0x49   :  { %s960_s19 = scalar_lea.hbm %s1323_s6, 1024 }
  0x4a   :  { %p961_p4 = scmp.ne.s32.totalorder %s1323_s6, %s960_s19  ;;  %p964_p5 = scmp.lt.u32.totalorder %s960_s19, %s1323_s6 }
  0x4c   :  { %p966_p6 = pnand %p964_p5, %p961_p4 }
  0x4e   :  { %969 = shalt.err (!%p966_p6)
}
  0x4f   :  { %s970_s2 = scalar_lea.vmem %s81_s15, 1024  ;;  %p975_p8 = scmp.lt.s32.totalorder %s81_s15, %s81_s15 }
  0x50   :  { %p971_p7 = scmp.ne.s32.totalorder %s81_s15, %s970_s2  ;;  %p976_p9 = scmp.lt.s32.totalorder %s970_s2, %s970_s2 }
  0x52   :  { %p977_p10 = por %p976_p9, %p975_p8 }
  0x54   :  { %p978_p11 = pnand %p977_p10, %p971_p7 }
  0x56   :  { %981 = shalt.err (!%p978_p11)
}
  0x57   :  { %86 = dma.hbm_to_vmem [thread:$0]  %s1323_s6, 1024, %s81_s15, [#allocation9], %s1066_s0, %s1066_s0, %s1067_s25  }
  0x58   :  { %s982_s28 = scalar_lea.hbm %s1325_s8, 1024 }
  0x59   :  { %p983_p12 = scmp.ne.s32.totalorder %s1325_s8, %s982_s28  ;;  %p986_p13 = scmp.lt.u32.totalorder %s982_s28, %s1325_s8 }
  0x5b   :  { %p988_p0 = pnand %p986_p13, %p983_p12 }
  0x5d   :  { %991 = shalt.err (!%p988_p0)
}
  0x5e   :  { %s992_s4 = scalar_lea.vmem %s1211_s17, 1024  ;;  %p997_p2 = scmp.lt.s32.totalorder %s1211_s17, %s1211_s17 }
  0x5f   :  { %p993_p1 = scmp.ne.s32.totalorder %s1211_s17, %s992_s4  ;;  %p998_p3 = scmp.lt.s32.totalorder %s992_s4, %s992_s4 }
  0x61   :  { %p999_p4 = por %p998_p3, %p997_p2 }
  0x63   :  { %p1000_p5 = pnand %p999_p4, %p993_p1 }
  0x65   :  { %1003 = shalt.err (!%p1000_p5)
}
  0x66   :  { %100 = dma.hbm_to_vmem [thread:$0]  %s1325_s8, 1024, %s1211_s17, [#allocation12], %s1066_s0, %s1066_s0, %s1067_s25  }
  0x67   :  { %1048 = dma.done.wait [#allocation3], 256  }
  0x68   :  { %1049 = vsyncadd [#allocation3], 4294967040 }
  0x69   :  { %1050 = dma.done.wait [#allocation6], 1280  }
  0x6a   :  { %1051 = vsyncadd [#allocation6], 4294966016 }
  0x6b   :  { %1052 = dma.done.wait [#allocation9], 3072  }
  0x6c   :  { %1053 = vsyncadd [#allocation9], 4294964224 }
  0x6d   :  { %1054 = dma.done.wait [#allocation12], 1024  }
  0x6e   :  { %1055 = vsyncadd [#allocation12], 4294966272  ;;  %v1070_v0 = vmov 0.0   ;;  %vm1071_vm0 = vmmov 0   ;;  %v820_v1 = vld [vmem:[#allocation7] sm:$0xff]   ;;  %v821_v2 = vld [vmem:[#allocation7 + $0x8] sm:$0xff]   ;;  %v260_v53 = vlaneseq }
  0x6f   :  { %743 = vmatprep.subr.bf16.mxu0 %v1070_v0  ;;  %759 = vmatprep.mubr.msk.bf16.mxu0 %vm1071_vm0, %v1070_v0  ;;  %v822_v3 = vld [vmem:[#allocation7 + $0x10] sm:$0xff]   ;;  %v823_v4 = vld [vmem:[#allocation7 + $0x18] sm:$0xff]   ;;  %v828_v5 = vld [vmem:[#allocation8 + $0x4] ss:$8 sps:$4 sm:$0xff]   ;;  %v1072_v28 = vmov 0   ;;  %s1073_s20 = smov [#allocation14]  }
  0x70   :  { %744 = vmatpush3.bf16.msra.mxu0 %v820_v1  ;;  %v830_v6 = vld [vmem:[#allocation8] ss:$8 sps:$4 sm:$0xff]   ;;  %v831_v7 = vld [vmem:[#allocation8 + $0x14] ss:$8 sps:$4 sm:$0xff]   ;;  %350 = vmatprep.subr.bf16.mxu1 %v828_v5  ;;  %v833_v8 = vld [vmem:[#allocation8 + $0x10] ss:$8 sps:$4 sm:$0xff]  }
  0x71   :  { %745 = vmatprep.subr.bf16.mxu0 %v1070_v0  ;;  %351 = vmatpush1.bf16.msra.mxu1 %v830_v6  ;;  %v834_v9 = vld [vmem:[#allocation8 + $0x24] ss:$8 sps:$4 sm:$0xff]   ;;  %v836_v12 = vld [vmem:[#allocation8 + $0x20] ss:$8 sps:$4 sm:$0xff]   ;;  %v837_v13 = vld [vmem:[#allocation8 + $0x34] ss:$8 sps:$4 sm:$0xff]  }
  0x72   :  { %352 = vmatprep.subr.bf16.mxu1 %v831_v7  ;;  %v824_v10 = vld [vmem:[#allocation7 + $0x20] sm:$0xff]   ;;  %v825_v11 = vld [vmem:[#allocation7 + $0x28] sm:$0xff]   ;;  %v839_v14 = vld [vmem:[#allocation8 + $0x30] ss:$8 sps:$4 sm:$0xff]   ;;  %382 = vmatprep.mubr.bf16.mxu1 %v1072_v28  ;;  %v261_v54 = vshrl.u32 %v260_v53, 7  ;;  %s654_s19 = sshll.u32 %s1073_s20, 4  ;;  %s655_s19 = int_to_ptr.vmem [resolvable:$true] %s654_s19 }
  0x73   :  { %v840_v15 = vld [vmem:[#allocation8 + $0x44] ss:$8 sps:$4 sm:$0xff]   ;;  %v826_v16 = vld [vmem:[#allocation7 + $0x30] sm:$0xff]   ;;  %v842_v17 = vld [vmem:[#allocation8 + $0x40] ss:$8 sps:$4 sm:$0xff]   ;;  %s1004_s21 = scalar_lea.vmem %s655_s19, 512  ;;  %p1009_p7 = scmp.lt.s32.totalorder %s655_s19, %s655_s19 }
  0x74   :  { %746 = vmatpush3.bf16.msra.mxu0 %v821_v2  ;;  %v843_v18 = vld [vmem:[#allocation8 + $0x54] ss:$8 sps:$4 sm:$0xff]   ;;  %v122_v20 = vld [vmem:[#allocation2] sm:$0xff]  ;;  %v123_v21 = vld [vmem:[#allocation2 + $0x8] sm:$0xff]  ;;  %v262_v55 = vsub.s32 0, %v261_v54  ;;  %v266_v57 = vsub.s32 1, %v261_v54  ;;  %p1005_p6 = scmp.ne.s32.totalorder %s655_s19, %s1004_s21  ;;  %p1010_p8 = scmp.lt.s32.totalorder %s1004_s21, %s1004_s21 }
  0x75   :  { %747 = vmatprep.subr.bf16.mxu0 %v1070_v0  ;;  %353 = vmatpush1.bf16.msra.mxu1 %v833_v8  ;;  %v827_v19 = vld [vmem:[#allocation7 + $0x38] sm:$0xff]   ;;  %v124_v23 = vpack.c.bf16 %v123_v21, %v122_v20  ;;  %v846_v24 = vld [vmem:[#allocation8 + $0x64] ss:$8 sps:$4 sm:$0xff]   ;;  %v848_v25 = vld [vmem:[#allocation8 + $0x60] ss:$8 sps:$4 sm:$0xff]  }
  0x76   :  { %354 = vmatprep.subr.bf16.mxu1 %v834_v9  ;;  %v845_v22 = vld [vmem:[#allocation8 + $0x50] ss:$8 sps:$4 sm:$0xff]   ;;  %v849_v26 = vld [vmem:[#allocation8 + $0x74] ss:$8 sps:$4 sm:$0xff]   ;;  %v852_v29 = vld [vmem:[#allocation10] sm:$0xff]   ;;  %p1011_p9 = por %p1010_p8, %p1009_p7 }
  0x77   :  { %v851_v27 = vld [vmem:[#allocation8 + $0x70] ss:$8 sps:$4 sm:$0xff]   ;;  %v673_v30 = vld [vmem:[%s1320_s3] ss:$0 sm:$0xff]  ;;  %v853_v40 = vld [vmem:[#allocation10 + $0x8] sm:$0xff]  }
  0x78   :  { %748 = vmatpush3.bf16.msra.mxu0 %v822_v3  ;;  %v854_v41 = vld [vmem:[#allocation10 + $0x10] sm:$0xff]   ;;  %v855_v42 = vld [vmem:[#allocation10 + $0x18] sm:$0xff]   ;;  %v856_v43 = vld [vmem:[#allocation10 + $0x20] sm:$0xff]   ;;  %p1012_p10 = pnand %p1011_p9, %p1005_p6 }
  0x79   :  { %749 = vmatprep.subr.bf16.mxu0 %v1070_v0  ;;  %355 = vmatpush1.bf16.msra.mxu1 %v836_v12  ;;  %v857_v44 = vld [vmem:[#allocation10 + $0x28] sm:$0xff]   ;;  %v858_v45 = vld [vmem:[#allocation10 + $0x30] sm:$0xff]   ;;  %v859_v46 = vld [vmem:[#allocation10 + $0x38] sm:$0xff]  }
  0x7a   :  { %356 = vmatprep.subr.bf16.mxu1 %v837_v13  ;;  %v860_v47 = vld [vmem:[#allocation11] sm:$0xff]   ;;  %v861_v48 = vld [vmem:[#allocation11 + $0x8] sm:$0xff]   ;;  %v862_v49 = vld [vmem:[#allocation11 + $0x10] sm:$0xff]  }
  0x7b   :  { %v863_v50 = vld [vmem:[#allocation11 + $0x18] sm:$0xff]   ;;  %v864_v51 = vld [vmem:[#allocation11 + $0x20] sm:$0xff]   ;;  %v865_v52 = vld [vmem:[#allocation11 + $0x28] sm:$0xff]  }
  0x7c   :  { %750 = vmatpush3.bf16.msra.mxu0 %v823_v4  ;;  %v258_v56 = vld [vmem:[%s1322_s5] sm:$0x3]  ;;  %v125_v9 = vld [vmem:[#allocation5] sm:$0xff] }
  0x7d   :  { %751 = vmatprep.subr.bf16.mxu0 %v1070_v0  ;;  %357 = vmatpush1.bf16.msra.mxu1 %v839_v14  ;;  %v263_v58 = vrot.slane %v258_v56, %v262_v55  ;;  %v267_v59 = vrot.slane %v258_v56, %v266_v57  ;;  %v698_v20 = vld [vmem:[%s1324_s7] ss:$0 sm:$0xff] }
  0x7e   :  { %358 = vmatprep.subr.bf16.mxu1 %v840_v15 }
  0x80   :  { %752 = vmatpush3.bf16.msra.mxu0 %v824_v10 }
  0x81   :  { %753 = vmatprep.subr.bf16.mxu0 %v1070_v0  ;;  %359 = vmatpush1.bf16.msra.mxu1 %v842_v17 }
  0x82   :  { %360 = vmatprep.subr.bf16.mxu1 %v843_v18  ;;  %v866_v18 = vld [vmem:[#allocation11 + $0x30] sm:$0xff]  }
  0x84   :  { %754 = vmatpush3.bf16.msra.mxu0 %v825_v11  ;;  %v126_v11 = vld [vmem:[#allocation5 + $0x8] sm:$0xff] }
  0x85   :  { %755 = vmatprep.subr.bf16.mxu0 %v1070_v0  ;;  %361 = vmatpush1.bf16.msra.mxu1 %v845_v22 }
  0x86   :  { %362 = vmatprep.subr.bf16.mxu1 %v846_v24 }
  0x88   :  { %756 = vmatpush3.bf16.msra.mxu0 %v826_v16 }
  0x89   :  { %757 = vmatprep.subr.bf16.mxu0 %v1070_v0  ;;  %363 = vmatpush1.bf16.msra.mxu1 %v848_v25 }
  0x8a   :  { %364 = vmatprep.subr.bf16.mxu1 %v849_v26 }
  0x8c   :  { %758 = vmatpush3.bf16.msra.mxu0 %v827_v19  ;;  %v867_v19 = vld [vmem:[#allocation11 + $0x38] sm:$0xff]  }
  0x8d   :  { %763 = vmatprep.subr.bf16.mxu0 %v1070_v0  ;;  %365 = vmatpush1.bf16.msra.mxu1 %v851_v27 }
  0x8e   :  { %783 = vmatprep.subr.bf16.mxu1 %v1070_v0 }
  0x8f   :  { %760 = vmatmul.mubr.bf16.vlgmr.msra.gmra.mrb[0].mxu0 %v124_v23 }
  0x90   :  { %779 = vmatprep.mubr.msk.bf16.mxu0 %vm1071_vm0, %v1070_v0  ;;  %764 = vmatpush3.bf16.msra.mxu0 %v852_v29 }
  0x91   :  { %765 = vmatprep.subr.bf16.mxu0 %v1070_v0 }
  0x94   :  { %766 = vmatpush3.bf16.msra.mxu0 %v853_v40 }
  0x95   :  { %767 = vmatprep.subr.bf16.mxu0 %v1070_v0 }
  0x98   :  { %768 = vmatpush3.bf16.msra.mxu0 %v854_v41 }
  0x99   :  { %769 = vmatprep.subr.bf16.mxu0 %v1070_v0 }
  0x9c   :  { %770 = vmatpush3.bf16.msra.mxu0 %v855_v42 }
  0x9d   :  { %771 = vmatprep.subr.bf16.mxu0 %v1070_v0 }
  0xa0   :  { %772 = vmatpush3.bf16.msra.mxu0 %v856_v43 }
  0xa1   :  { %773 = vmatprep.subr.bf16.mxu0 %v1070_v0 }
  0xa4   :  { %774 = vmatpush3.bf16.msra.mxu0 %v857_v44 }
  0xa5   :  { %775 = vmatprep.subr.bf16.mxu0 %v1070_v0 }
  0xa8   :  { %776 = vmatpush3.bf16.msra.mxu0 %v858_v45 }
  0xa9   :  { %777 = vmatprep.subr.bf16.mxu0 %v1070_v0 }
  0xac   :  { %778 = vmatpush3.bf16.msra.mxu0 %v859_v46 }
 0x162   :  { %v232_v31 = vpop.f32.mrb[0].mxu0 }
 0x163   :  { %v233_v32 = vadd.f32 %v673_v30, %v232_v31  ;;  %v761_v33 = vpop.f32.mrb[1].mxu0 }
 0x164   :  { %v235_v34 = vpop.f32.mrb[2].mxu0 }
 0x165   :  { %v236_v35 = vadd.f32 %v673_v30, %v235_v34  ;;  %v762_v36 = vpop.f32.mrb[3].mxu0  ;;  %v239_v37 = vmax.f32 %v233_v32, 0.0 }
 0x167   :  { %v240_v38 = vmax.f32 %v236_v35, 0.0 }
 0x169   :  { %v241_v39 = vpack.c.bf16 %v240_v38, %v239_v37 }
 0x16b   :  { %383 = vmatmul.mubr.bf16.vlgmr.msra.gmra.mrb[0].mxu1 %v241_v39 }
 0x16c   :  { %799 = vmatprep.mubr.msk.bf16.mxu1 %vm1071_vm0, %v1070_v0  ;;  %784 = vmatpush3.bf16.msra.mxu1 %v860_v47 }
 0x16d   :  { %785 = vmatprep.subr.bf16.mxu1 %v1070_v0 }
 0x170   :  { %786 = vmatpush3.bf16.msra.mxu1 %v861_v48 }
 0x171   :  { %787 = vmatprep.subr.bf16.mxu1 %v1070_v0 }
 0x174   :  { %788 = vmatpush3.bf16.msra.mxu1 %v862_v49 }
 0x175   :  { %789 = vmatprep.subr.bf16.mxu1 %v1070_v0 }
 0x178   :  { %790 = vmatpush3.bf16.msra.mxu1 %v863_v50 }
 0x179   :  { %791 = vmatprep.subr.bf16.mxu1 %v1070_v0 }
 0x17c   :  { %792 = vmatpush3.bf16.msra.mxu1 %v864_v51 }
 0x17d   :  { %793 = vmatprep.subr.bf16.mxu1 %v1070_v0 }
 0x180   :  { %794 = vmatpush3.bf16.msra.mxu1 %v865_v52 }
 0x181   :  { %795 = vmatprep.subr.bf16.mxu1 %v1070_v0 }
 0x184   :  { %796 = vmatpush3.bf16.msra.mxu1 %v866_v18 }
 0x185   :  { %797 = vmatprep.subr.bf16.mxu1 %v1070_v0 }
 0x188   :  { %798 = vmatpush3.bf16.msra.mxu1 %v867_v19 }
 0x23e   :  { %v384_v60 = vpop.f32.mrb[0].mxu1 }
 0x23f   :  { %v385_v61 = vadd.f32 %v384_v60, %v263_v58  ;;  %v386_v62 = vpop.f32.mrb[1].mxu1 }
 0x240   :  { %v387_v63 = vadd.f32 %v386_v62, %v267_v59  ;;  %v388_v1 = vpop.f32.mrb[2].mxu1 }
 0x241   :  { %633 = vst [vmem:[#allocation14] sm:$0xff] %v385_v61  ;;  %v389_v2 = vadd.f32 %v388_v1, %v263_v58  ;;  %v390_v3 = vpop.f32.mrb[3].mxu1 }
 0x242   :  { %v393_v4 = vmul.f32 0.5, %v387_v63  ;;  %634 = vst [vmem:[#allocation14 + $0x8] sm:$0xff] %v387_v63  ;;  %v391_v5 = vadd.f32 %v390_v3, %v267_v59 }
 0x243   :  { %635 = vst [vmem:[#allocation14 + $0x10] sm:$0xff] %v389_v2 }
 0x244   :  { %v395_v6 = vmul.f32 1.442695, %v393_v4  ;;  %v394_v7 = vmul.f32 0.5, %v391_v5  ;;  %636 = vst [vmem:[#allocation14 + $0x18] sm:$0xff] %v391_v5 }
 0x246   :  { %868 = vpow2.f32 %v395_v6  ;;  %v397_v8 = vmul.f32 1.442695, %v394_v7 }
 0x248   :  { %870 = vpow2.f32 %v397_v8 }
 0x250   :  { %v869_v10 = vpop.eup %868 }
 0x251   :  { %v399_v12 = vmul.f32 %v869_v10, %v125_v9 }
 0x252   :  { %v871_v13 = vpop.eup %870 }
 0x253   :  { %v400_v14 = vmul.f32 %v871_v13, %v126_v11  ;;  %v401_v15 = vadd.f32 %v399_v12, %v385_v61 }
 0x255   :  { %v402_v16 = vadd.f32 %v400_v14, %v389_v2 }
 0x257   :  { %v403_v17 = vpack.c.bf16 %v402_v16, %v401_v15 }
 0x259   :  { %780 = vmatmul.mubr.bf16.vlgmr.msra.gmra.mrb[4].mxu0 %v403_v17 }
 0x32c   :  { %v509_v21 = vpop.f32.mrb[4].mxu0 }
 0x32d   :  { %v510_v22 = vadd.f32 %v698_v20, %v509_v21  ;;  %v781_v23 = vpop.f32.mrb[5].mxu0 }
 0x32e   :  { %v512_v24 = vpop.f32.mrb[6].mxu0 }
 0x32f   :  { %v513_v25 = vadd.f32 %v698_v20, %v512_v24  ;;  %v782_v26 = vpop.f32.mrb[7].mxu0  ;;  %v516_v27 = vmax.f32 %v510_v22, 0.0 }
 0x331   :  { %v517_v28 = vmax.f32 %v513_v25, 0.0 }
 0x333   :  { %v518_v29 = vpack.c.bf16 %v517_v28, %v516_v27 }
 0x335   :  { %800 = vmatmul.mubr.bf16.vlgmr.msra.gmra.mrb[4].mxu1 %v518_v29 }
 0x336   :  { %1015 = shalt.err (!%p1012_p10)
}
 0x337   :  { %s1016_s23 = scalar_lea.hbm %s1328_s11, 512 }
 0x338   :  { %p1017_p11 = scmp.ne.s32.totalorder %s1328_s11, %s1016_s23  ;;  %p1020_p12 = scmp.lt.u32.totalorder %s1016_s23, %s1328_s11 }
 0x33a   :  { %p1022_p13 = pnand %p1020_p12, %p1017_p11 }
 0x33c   :  { %1025 = shalt.err (!%p1022_p13)
}
 0x33d   :  { %s1074_s24 = smov 256   ;;  %s1075_s26 = smov 16   ;;  %v707_v0 = vld [vmem:[%s1326_s9] ss:$0 sm:$0xff] }
 0x33e   :  { %660 = dma.vmem_to_hbm [thread:$0]  %s655_s19, 512, %s1328_s11, [#allocation15], %s1074_s24, %s1074_s24, %s1075_s26  }
 0x33f   :  { %s1076_s16 = smov [#allocation13]  }
 0x340   :  { %s642_s4 = sshll.u32 %s1076_s16, 4  ;;  %s643_s4 = int_to_ptr.vmem [resolvable:$true] %s642_s4 }
 0x341   :  { %s1026_s6 = scalar_lea.vmem %s643_s4, 256  ;;  %p1031_p1 = scmp.lt.s32.totalorder %s643_s4, %s643_s4 }
 0x342   :  { %p1027_p0 = scmp.ne.s32.totalorder %s643_s4, %s1026_s6  ;;  %p1032_p2 = scmp.lt.s32.totalorder %s1026_s6, %s1026_s6 }
 0x344   :  { %p1033_p3 = por %p1032_p2, %p1031_p1 }
 0x346   :  { %p1034_p4 = pnand %p1033_p3, %p1027_p0 }
 0x408   :  { %v624_v30 = vpop.f32.mrb[4].mxu1 }
 0x409   :  { %v625_v31 = vadd.f32 %v707_v0, %v624_v30  ;;  %v801_v32 = vpop.f32.mrb[5].mxu1 }
 0x40a   :  { %v627_v33 = vpop.f32.mrb[6].mxu1 }
 0x40b   :  { %631 = vst [vmem:[#allocation13] sm:$0xff] %v625_v31  ;;  %v628_v34 = vadd.f32 %v707_v0, %v627_v33  ;;  %v802_v35 = vpop.f32.mrb[7].mxu1 }
 0x40d   :  { %632 = vst [vmem:[#allocation13 + $0x8] sm:$0xff] %v628_v34 }
 0x40e   :  { %1037 = shalt.err (!%p1034_p4)
}
 0x40f   :  { %s1038_s15 = scalar_lea.hbm %s1327_s10, 256 }
 0x410   :  { %p1039_p5 = scmp.ne.s32.totalorder %s1327_s10, %s1038_s15  ;;  %p1042_p6 = scmp.lt.u32.totalorder %s1038_s15, %s1327_s10 }
 0x412   :  { %p1044_p7 = pnand %p1042_p6, %p1039_p5 }
 0x414   :  { %1047 = shalt.err (!%p1044_p7)
}
 0x415   :  { %648 = dma.vmem_to_hbm [thread:$0]  %s643_s4, 256, %s1327_s10, [#allocation4], %s1062_s29, %s1062_s29, %s1063_s30  }
 0x416   :  { %1056 = dma.done.wait [#allocation4], 256  }
 0x417   :  { %1057 = vsyncadd [#allocation4], 4294967040 }
 0x418   :  { %1058 = dma.done.wait [#allocation15], 512  }
 0x419   :  { %1059 = vsyncadd [#allocation15], 4294966784 }
 0x41a   :  { %667 = vsyncpa [#allocation3], 1 }
 0x41b   :  { %668 = vsyncpa [#allocation6], 1 }
 0x41c   :  { %669 = vsyncpa [#allocation9], 1 }
 0x41d   :  { %670 = vsyncpa [#allocation12], 1 }
 0x41e   :  { %671 = vsyncpa [#allocation4], 1 }
 0x41f   :  { %672 = vsyncpa [#allocation15], 1 }

// kernel: tpu_custom_call.1
= control target key start
LH: loop header
LB: loop body
LE: loop exit
PB: predicated region body
PF: predicated region fallthrough
CT: control target
= control target key end

     0   :  { %17 = vsyncpa [#allocation3], 0  ;;  %s1317_s0 = inlined_call_operand.hbm [shape: f32[16,128], index: 0, kind: input, shape index: {}]   ;;  %s1318_s1 = inlined_call_operand.hbm [shape: f32[16,128], index: 1, kind: input, shape index: {}]   ;;  %s1319_s2 = inlined_call_operand.hbm [shape: bf16[128,128], index: 2, kind: input, shape index: {}]   ;;  %s1320_s3 = inlined_call_operand.vmem [shape: f32[1,128], index: 3, kind: input, shape index: {}]   ;;  %s1321_s4 = inlined_call_operand.hbm [shape: bf16[128,256], index: 4, kind: input, shape index: {}]   ;;  %s1322_s5 = inlined_call_operand.vmem [shape: f32[1,256], index: 5, kind: input, shape index: {}]   ;;  %s1323_s6 = inlined_call_operand.hbm [shape: bf16[128,128], index: 6, kind: input, shape index: {}]   ;;  %s1324_s7 = inlined_call_operand.vmem [shape: f32[1,128], index: 7, kind: input, shape index: {}]   ;;  %s1325_s8 = inlined_call_operand.hbm [shape: bf16[128,128], index: 8, kind: input, shape index: {}]   ;;  %s1326_s9 = inlined_call_operand.vmem [shape: f32[1,128], index: 9, kind: input, shape index: {}]   ;;  %s1327_s10 = inlined_call_operand.hbm [shape: f32[16,128], index: 10, kind: output, shape index: {0}]   ;;  %s1328_s11 = inlined_call_operand.hbm [shape: f32[16,256], index: 11, kind: output, shape index: {1}]  }
   0x1   :  { %18 = vsyncpa [#allocation6], 0 }
   0x2   :  { %19 = vsyncpa [#allocation9], 0 }
   0x3   :  { %20 = vsyncpa [#allocation12], 0 }
   0x4   :  { %21 = vsyncpa [#allocation4], 0 }
   0x5   :  { %22 = vsyncpa [#allocation15], 0  ;;  %s1060_s17 = smov [#allocation5]   ;;  %s1061_s19 = smov [#allocation8]  }
   0x6   :  { %s40_s18 = sshll.u32 %s1060_s17, 4  ;;  %s66_s20 = sshll.u32 %s1061_s19, 4  ;;  %s41_s18 = int_to_ptr.vmem [resolvable:$true] %s40_s18  ;;  %s1137_s20 = int_to_ptr.vmem [resolvable:$true] %s66_s20 }
   0x7   :  { %s872_s23 = scalar_lea.hbm %s1318_s1, 256 }
   0x8   :  { %p873_p0 = scmp.ne.s32.totalorder %s1318_s1, %s872_s23  ;;  %p876_p1 = scmp.lt.u32.totalorder %s872_s23, %s1318_s1 }
   0xa   :  { %p878_p2 = pnand %p876_p1, %p873_p0 }
   0xc   :  { %881 = shalt.err (!%p878_p2)
}
   0xd   :  { %s882_s28 = scalar_lea.vmem %s41_s18, 256  ;;  %p887_p4 = scmp.lt.s32.totalorder %s41_s18, %s41_s18 }
   0xe   :  { %p883_p3 = scmp.ne.s32.totalorder %s41_s18, %s882_s28  ;;  %p888_p5 = scmp.lt.s32.totalorder %s882_s28, %s882_s28 }
  0x10   :  { %p889_p6 = por %p888_p5, %p887_p4 }
  0x12   :  { %p890_p7 = pnand %p889_p6, %p883_p3 }
  0x14   :  { %893 = shalt.err (!%p890_p7)
}
  0x15   :  { %s1062_s29 = smov 128   ;;  %s1063_s30 = smov 8  }
  0x16   :  { %46 = dma.hbm_to_vmem [thread:$0]  %s1318_s1, 256, %s41_s18, [#allocation6], %s1062_s29, %s1062_s29, %s1063_s30  }
  0x17   :  { %s894_s16 = scalar_lea.hbm %s1321_s4, 2048 }
  0x18   :  { %p895_p8 = scmp.ne.s32.totalorder %s1321_s4, %s894_s16  ;;  %p898_p9 = scmp.lt.u32.totalorder %s894_s16, %s1321_s4 }
  0x1a   :  { %p900_p10 = pnand %p898_p9, %p895_p8 }
  0x1c   :  { %903 = shalt.err (!%p900_p10)
}
  0x1d   :  { %s904_s23 = scalar_lea.vmem %s1137_s20, 2048  ;;  %p909_p12 = scmp.lt.s32.totalorder %s1137_s20, %s1137_s20 }
  0x1e   :  { %p905_p11 = scmp.ne.s32.totalorder %s1137_s20, %s904_s23  ;;  %p910_p13 = scmp.lt.s32.totalorder %s904_s23, %s904_s23 }
  0x20   :  { %p911_p0 = por %p910_p13, %p909_p12 }
  0x22   :  { %p912_p1 = pnand %p911_p0, %p905_p11 }
  0x24   :  { %915 = shalt.err (!%p912_p1)
}
  0x25   :  { %72 = dma.hbm_to_vmem [thread:$0]  %s1321_s4, 2048, %s1137_s20, [#allocation9], %s1062_s29, %s1062_s29, %s1063_s30  }
  0x26   :  { %s1064_s24 = smov [#allocation2]   ;;  %s1065_s26 = smov [#allocation7]  }
  0x27   :  { %s28_s25 = sshll.u32 %s1064_s24, 4  ;;  %s52_s27 = sshll.u32 %s1065_s26, 4  ;;  %s29_s25 = int_to_ptr.vmem [resolvable:$true] %s28_s25  ;;  %s1174_s27 = int_to_ptr.vmem [resolvable:$true] %s52_s27 }
  0x28   :  { %s916_s13 = scalar_lea.hbm %s1317_s0, 256 }
  0x29   :  { %p917_p2 = scmp.ne.s32.totalorder %s1317_s0, %s916_s13  ;;  %p920_p3 = scmp.lt.u32.totalorder %s916_s13, %s1317_s0 }
  0x2b   :  { %p922_p4 = pnand %p920_p3, %p917_p2 }
  0x2d   :  { %925 = shalt.err (!%p922_p4)
}
  0x2e   :  { %s926_s4 = scalar_lea.vmem %s29_s25, 256  ;;  %p931_p6 = scmp.lt.s32.totalorder %s29_s25, %s29_s25 }
  0x2f   :  { %p927_p5 = scmp.ne.s32.totalorder %s29_s25, %s926_s4  ;;  %p932_p7 = scmp.lt.s32.totalorder %s926_s4, %s926_s4 }
  0x31   :  { %p933_p8 = por %p932_p7, %p931_p6 }
  0x33   :  { %p934_p9 = pnand %p933_p8, %p927_p5 }
  0x35   :  { %937 = shalt.err (!%p934_p9)
}
  0x36   :  { %34 = dma.hbm_to_vmem [thread:$0]  %s1317_s0, 256, %s29_s25, [#allocation3], %s1062_s29, %s1062_s29, %s1063_s30  }
  0x37   :  { %s938_s23 = scalar_lea.hbm %s1319_s2, 1024 }
  0x38   :  { %p939_p10 = scmp.ne.s32.totalorder %s1319_s2, %s938_s23  ;;  %p942_p11 = scmp.lt.u32.totalorder %s938_s23, %s1319_s2 }
  0x3a   :  { %p944_p12 = pnand %p942_p11, %p939_p10 }
  0x3c   :  { %947 = shalt.err (!%p944_p12)
}
  0x3d   :  { %s948_s28 = scalar_lea.vmem %s1174_s27, 1024  ;;  %p953_p0 = scmp.lt.s32.totalorder %s1174_s27, %s1174_s27 }
  0x3e   :  { %p949_p13 = scmp.ne.s32.totalorder %s1174_s27, %s948_s28  ;;  %p954_p1 = scmp.lt.s32.totalorder %s948_s28, %s948_s28 }
  0x40   :  { %p955_p2 = por %p954_p1, %p953_p0 }
  0x42   :  { %p956_p3 = pnand %p955_p2, %p949_p13 }
  0x44   :  { %959 = shalt.err (!%p956_p3)
}
  0x45   :  { %s1066_s0 = smov 64   ;;  %s1067_s25 = smov 4  }
  0x46   :  { %58 = dma.hbm_to_vmem [thread:$0]  %s1319_s2, 1024, %s1174_s27, [#allocation6], %s1066_s0, %s1066_s0, %s1067_s25  }
  0x47   :  { %s1068_s14 = smov [#allocation10]   ;;  %s1069_s16 = smov [#allocation11]  }
  0x48   :  { %s80_s15 = sshll.u32 %s1068_s14, 4  ;;  %s94_s17 = sshll.u32 %s1069_s16, 4  ;;  %s81_s15 = int_to_ptr.vmem [resolvable:$true] %s80_s15  ;;  %s1211_s17 = int_to_ptr.vmem [resolvable:$true] %s94_s17 }
  0x49   :  { %s960_s19 = scalar_lea.hbm %s1323_s6, 1024 }
  0x4a   :  { %p961_p4 = scmp.ne.s32.totalorder %s1323_s6, %s960_s19  ;;  %p964_p5 = scmp.lt.u32.totalorder %s960_s19, %s1323_s6 }
  0x4c   :  { %p966_p6 = pnand %p964_p5, %p961_p4 }
  0x4e   :  { %969 = shalt.err (!%p966_p6)
}
  0x4f   :  { %s970_s2 = scalar_lea.vmem %s81_s15, 1024  ;;  %p975_p8 = scmp.lt.s32.totalorder %s81_s15, %s81_s15 }
  0x50   :  { %p971_p7 = scmp.ne.s32.totalorder %s81_s15, %s970_s2  ;;  %p976_p9 = scmp.lt.s32.totalorder %s970_s2, %s970_s2 }
  0x52   :  { %p977_p10 = por %p976_p9, %p975_p8 }
  0x54   :  { %p978_p11 = pnand %p977_p10, %p971_p7 }
  0x56   :  { %981 = shalt.err (!%p978_p11)
}
  0x57   :  { %86 = dma.hbm_to_vmem [thread:$0]  %s1323_s6, 1024, %s81_s15, [#allocation9], %s1066_s0, %s1066_s0, %s1067_s25  }
  0x58   :  { %s982_s28 = scalar_lea.hbm %s1325_s8, 1024 }
  0x59   :  { %p983_p12 = scmp.ne.s32.totalorder %s1325_s8, %s982_s28  ;;  %p986_p13 = scmp.lt.u32.totalorder %s982_s28, %s1325_s8 }
  0x5b   :  { %p988_p0 = pnand %p986_p13, %p983_p12 }
  0x5d   :  { %991 = shalt.err (!%p988_p0)
}
  0x5e   :  { %s992_s4 = scalar_lea.vmem %s1211_s17, 1024  ;;  %p997_p2 = scmp.lt.s32.totalorder %s1211_s17, %s1211_s17 }
  0x5f   :  { %p993_p1 = scmp.ne.s32.totalorder %s1211_s17, %s992_s4  ;;  %p998_p3 = scmp.lt.s32.totalorder %s992_s4, %s992_s4 }
  0x61   :  { %p999_p4 = por %p998_p3, %p997_p2 }
  0x63   :  { %p1000_p5 = pnand %p999_p4, %p993_p1 }
  0x65   :  { %1003 = shalt.err (!%p1000_p5)
}
  0x66   :  { %100 = dma.hbm_to_vmem [thread:$0]  %s1325_s8, 1024, %s1211_s17, [#allocation12], %s1066_s0, %s1066_s0, %s1067_s25  }
  0x67   :  { %1048 = dma.done.wait [#allocation3], 256  }
  0x68   :  { %1049 = vsyncadd [#allocation3], 4294967040 }
  0x69   :  { %1050 = dma.done.wait [#allocation6], 1280  }
  0x6a   :  { %1051 = vsyncadd [#allocation6], 4294966016 }
  0x6b   :  { %1052 = dma.done.wait [#allocation9], 3072  }
  0x6c   :  { %1053 = vsyncadd [#allocation9], 4294964224 }
  0x6d   :  { %1054 = dma.done.wait [#allocation12], 1024  }
  0x6e   :  { %1055 = vsyncadd [#allocation12], 4294966272  ;;  %v1070_v0 = vmov 0.0   ;;  %vm1071_vm0 = vmmov 0   ;;  %v820_v1 = vld [vmem:[#allocation7] sm:$0xff]   ;;  %v821_v2 = vld [vmem:[#allocation7 + $0x8] sm:$0xff]   ;;  %v260_v53 = vlaneseq }
  0x6f   :  { %743 = vmatprep.subr.bf16.mxu0 %v1070_v0  ;;  %759 = vmatprep.mubr.msk.bf16.mxu0 %vm1071_vm0, %v1070_v0  ;;  %v822_v3 = vld [vmem:[#allocation7 + $0x10] sm:$0xff]   ;;  %v823_v4 = vld [vmem:[#allocation7 + $0x18] sm:$0xff]   ;;  %v828_v5 = vld [vmem:[#allocation8 + $0x4] ss:$8 sps:$4 sm:$0xff]   ;;  %v1072_v28 = vmov 0   ;;  %s1073_s20 = smov [#allocation14]  }
  0x70   :  { %744 = vmatpush3.bf16.msra.mxu0 %v820_v1  ;;  %v830_v6 = vld [vmem:[#allocation8] ss:$8 sps:$4 sm:$0xff]   ;;  %v831_v7 = vld [vmem:[#allocation8 + $0x14] ss:$8 sps:$4 sm:$0xff]   ;;  %350 = vmatprep.subr.bf16.mxu1 %v828_v5  ;;  %v833_v8 = vld [vmem:[#allocation8 + $0x10] ss:$8 sps:$4 sm:$0xff]  }
  0x71   :  { %745 = vmatprep.subr.bf16.mxu0 %v1070_v0  ;;  %351 = vmatpush1.bf16.msra.mxu1 %v830_v6  ;;  %v834_v9 = vld [vmem:[#allocation8 + $0x24] ss:$8 sps:$4 sm:$0xff]   ;;  %v836_v12 = vld [vmem:[#allocation8 + $0x20] ss:$8 sps:$4 sm:$0xff]   ;;  %v837_v13 = vld [vmem:[#allocation8 + $0x34] ss:$8 sps:$4 sm:$0xff]  }
  0x72   :  { %352 = vmatprep.subr.bf16.mxu1 %v831_v7  ;;  %v824_v10 = vld [vmem:[#allocation7 + $0x20] sm:$0xff]   ;;  %v825_v11 = vld [vmem:[#allocation7 + $0x28] sm:$0xff]   ;;  %v839_v14 = vld [vmem:[#allocation8 + $0x30] ss:$8 sps:$4 sm:$0xff]   ;;  %382 = vmatprep.mubr.bf16.mxu1 %v1072_v28  ;;  %v261_v54 = vshrl.u32 %v260_v53, 7  ;;  %s654_s19 = sshll.u32 %s1073_s20, 4  ;;  %s655_s19 = int_to_ptr.vmem [resolvable:$true] %s654_s19 }
  0x73   :  { %v840_v15 = vld [vmem:[#allocation8 + $0x44] ss:$8 sps:$4 sm:$0xff]   ;;  %v826_v16 = vld [vmem:[#allocation7 + $0x30] sm:$0xff]   ;;  %v842_v17 = vld [vmem:[#allocation8 + $0x40] ss:$8 sps:$4 sm:$0xff]   ;;  %s1004_s21 = scalar_lea.vmem %s655_s19, 512  ;;  %p1009_p7 = scmp.lt.s32.totalorder %s655_s19, %s655_s19 }
  0x74   :  { %746 = vmatpush3.bf16.msra.mxu0 %v821_v2  ;;  %v843_v18 = vld [vmem:[#allocation8 + $0x54] ss:$8 sps:$4 sm:$0xff]   ;;  %v122_v20 = vld [vmem:[#allocation2] sm:$0xff]  ;;  %v123_v21 = vld [vmem:[#allocation2 + $0x8] sm:$0xff]  ;;  %v262_v55 = vsub.s32 0, %v261_v54  ;;  %v266_v57 = vsub.s32 1, %v261_v54  ;;  %p1005_p6 = scmp.ne.s32.totalorder %s655_s19, %s1004_s21  ;;  %p1010_p8 = scmp.lt.s32.totalorder %s1004_s21, %s1004_s21 }
  0x75   :  { %747 = vmatprep.subr.bf16.mxu0 %v1070_v0  ;;  %353 = vmatpush1.bf16.msra.mxu1 %v833_v8  ;;  %v827_v19 = vld [vmem:[#allocation7 + $0x38] sm:$0xff]   ;;  %v124_v23 = vpack.c.bf16 %v123_v21, %v122_v20  ;;  %v846_v24 = vld [vmem:[#allocation8 + $0x64] ss:$8 sps:$4 sm:$0xff]   ;;  %v848_v25 = vld [vmem:[#allocation8 + $0x60] ss:$8 sps:$4 sm:$0xff]  }
  0x76   :  { %354 = vmatprep.subr.bf16.mxu1 %v834_v9  ;;  %v845_v22 = vld [vmem:[#allocation8 + $0x50] ss:$8 sps:$4 sm:$0xff]   ;;  %v849_v26 = vld [vmem:[#allocation8 + $0x74] ss:$8 sps:$4 sm:$0xff]   ;;  %v852_v29 = vld [vmem:[#allocation10] sm:$0xff]   ;;  %p1011_p9 = por %p1010_p8, %p1009_p7 }
  0x77   :  { %v851_v27 = vld [vmem:[#allocation8 + $0x70] ss:$8 sps:$4 sm:$0xff]   ;;  %v673_v30 = vld [vmem:[%s1320_s3] ss:$0 sm:$0xff]  ;;  %v853_v40 = vld [vmem:[#allocation10 + $0x8] sm:$0xff]  }
  0x78   :  { %748 = vmatpush3.bf16.msra.mxu0 %v822_v3  ;;  %v854_v41 = vld [vmem:[#allocation10 + $0x10] sm:$0xff]   ;;  %v855_v42 = vld [vmem:[#allocation10 + $0x18] sm:$0xff]   ;;  %v856_v43 = vld [vmem:[#allocation10 + $0x20] sm:$0xff]   ;;  %p1012_p10 = pnand %p1011_p9, %p1005_p6 }
  0x79   :  { %749 = vmatprep.subr.bf16.mxu0 %v1070_v0  ;;  %355 = vmatpush1.bf16.msra.mxu1 %v836_v12  ;;  %v857_v44 = vld [vmem:[#allocation10 + $0x28] sm:$0xff]   ;;  %v858_v45 = vld [vmem:[#allocation10 + $0x30] sm:$0xff]   ;;  %v859_v46 = vld [vmem:[#allocation10 + $0x38] sm:$0xff]  }
  0x7a   :  { %356 = vmatprep.subr.bf16.mxu1 %v837_v13  ;;  %v860_v47 = vld [vmem:[#allocation11] sm:$0xff]   ;;  %v861_v48 = vld [vmem:[#allocation11 + $0x8] sm:$0xff]   ;;  %v862_v49 = vld [vmem:[#allocation11 + $0x10] sm:$0xff]  }
  0x7b   :  { %v863_v50 = vld [vmem:[#allocation11 + $0x18] sm:$0xff]   ;;  %v864_v51 = vld [vmem:[#allocation11 + $0x20] sm:$0xff]   ;;  %v865_v52 = vld [vmem:[#allocation11 + $0x28] sm:$0xff]  }
  0x7c   :  { %750 = vmatpush3.bf16.msra.mxu0 %v823_v4  ;;  %v258_v56 = vld [vmem:[%s1322_s5] sm:$0x3]  ;;  %v125_v9 = vld [vmem:[#allocation5] sm:$0xff] }
  0x7d   :  { %751 = vmatprep.subr.bf16.mxu0 %v1070_v0  ;;  %357 = vmatpush1.bf16.msra.mxu1 %v839_v14  ;;  %v263_v58 = vrot.slane %v258_v56, %v262_v55  ;;  %v267_v59 = vrot.slane %v258_v56, %v266_v57  ;;  %v698_v20 = vld [vmem:[%s1324_s7] ss:$0 sm:$0xff] }
  0x7e   :  { %358 = vmatprep.subr.bf16.mxu1 %v840_v15 }
  0x80   :  { %752 = vmatpush3.bf16.msra.mxu0 %v824_v10 }
  0x81   :  { %753 = vmatprep.subr.bf16.mxu0 %v1070_v0  ;;  %359 = vmatpush1.bf16.msra.mxu1 %v842_v17 }
  0x82   :  { %360 = vmatprep.subr.bf16.mxu1 %v843_v18  ;;  %v866_v18 = vld [vmem:[#allocation11 + $0x30] sm:$0xff]  }
  0x84   :  { %754 = vmatpush3.bf16.msra.mxu0 %v825_v11  ;;  %v126_v11 = vld [vmem:[#allocation5 + $0x8] sm:$0xff] }
  0x85   :  { %755 = vmatprep.subr.bf16.mxu0 %v1070_v0  ;;  %361 = vmatpush1.bf16.msra.mxu1 %v845_v22 }
  0x86   :  { %362 = vmatprep.subr.bf16.mxu1 %v846_v24 }
  0x88   :  { %756 = vmatpush3.bf16.msra.mxu0 %v826_v16 }
  0x89   :  { %757 = vmatprep.subr.bf16.mxu0 %v1070_v0  ;;  %363 = vmatpush1.bf16.msra.mxu1 %v848_v25 }
  0x8a   :  { %364 = vmatprep.subr.bf16.mxu1 %v849_v26 }
  0x8c   :  { %758 = vmatpush3.bf16.msra.mxu0 %v827_v19  ;;  %v867_v19 = vld [vmem:[#allocation11 + $0x38] sm:$0xff]  }
  0x8d   :  { %763 = vmatprep.subr.bf16.mxu0 %v1070_v0  ;;  %365 = vmatpush1.bf16.msra.mxu1 %v851_v27 }
  0x8e   :  { %783 = vmatprep.subr.bf16.mxu1 %v1070_v0 }
  0x8f   :  { %760 = vmatmul.mubr.bf16.vlgmr.msra.gmra.mrb[0].mxu0 %v124_v23 }
  0x90   :  { %779 = vmatprep.mubr.msk.bf16.mxu0 %vm1071_vm0, %v1070_v0  ;;  %764 = vmatpush3.bf16.msra.mxu0 %v852_v29 }
  0x91   :  { %765 = vmatprep.subr.bf16.mxu0 %v1070_v0 }
  0x94   :  { %766 = vmatpush3.bf16.msra.mxu0 %v853_v40 }
  0x95   :  { %767 = vmatprep.subr.bf16.mxu0 %v1070_v0 }
  0x98   :  { %768 = vmatpush3.bf16.msra.mxu0 %v854_v41 }
  0x99   :  { %769 = vmatprep.subr.bf16.mxu0 %v1070_v0 }
  0x9c   :  { %770 = vmatpush3.bf16.msra.mxu0 %v855_v42 }
  0x9d   :  { %771 = vmatprep.subr.bf16.mxu0 %v1070_v0 }
  0xa0   :  { %772 = vmatpush3.bf16.msra.mxu0 %v856_v43 }
  0xa1   :  { %773 = vmatprep.subr.bf16.mxu0 %v1070_v0 }
  0xa4   :  { %774 = vmatpush3.bf16.msra.mxu0 %v857_v44 }
  0xa5   :  { %775 = vmatprep.subr.bf16.mxu0 %v1070_v0 }
  0xa8   :  { %776 = vmatpush3.bf16.msra.mxu0 %v858_v45 }
  0xa9   :  { %777 = vmatprep.subr.bf16.mxu0 %v1070_v0 }
  0xac   :  { %778 = vmatpush3.bf16.msra.mxu0 %v859_v46 }
 0x162   :  { %v232_v31 = vpop.f32.mrb[0].mxu0 }
 0x163   :  { %v233_v32 = vadd.f32 %v673_v30, %v232_v31  ;;  %v761_v33 = vpop.f32.mrb[1].mxu0 }
 0x164   :  { %v235_v34 = vpop.f32.mrb[2].mxu0 }
 0x165   :  { %v236_v35 = vadd.f32 %v673_v30, %v235_v34  ;;  %v762_v36 = vpop.f32.mrb[3].mxu0  ;;  %v239_v37 = vmax.f32 %v233_v32, 0.0 }
 0x167   :  { %v240_v38 = vmax.f32 %v236_v35, 0.0 }
 0x169   :  { %v241_v39 = vpack.c.bf16 %v240_v38, %v239_v37 }
 0x16b   :  { %383 = vmatmul.mubr.bf16.vlgmr.msra.gmra.mrb[0].mxu1 %v241_v39 }
 0x16c   :  { %799 = vmatprep.mubr.msk.bf16.mxu1 %vm1071_vm0, %v1070_v0  ;;  %784 = vmatpush3.bf16.msra.mxu1 %v860_v47 }
 0x16d   :  { %785 = vmatprep.subr.bf16.mxu1 %v1070_v0 }
 0x170   :  { %786 = vmatpush3.bf16.msra.mxu1 %v861_v48 }
 0x171   :  { %787 = vmatprep.subr.bf16.mxu1 %v1070_v0 }
 0x174   :  { %788 = vmatpush3.bf16.msra.mxu1 %v862_v49 }
 0x175   :  { %789 = vmatprep.subr.bf16.mxu1 %v1070_v0 }
 0x178   :  { %790 = vmatpush3.bf16.msra.mxu1 %v863_v50 }
 0x179   :  { %791 = vmatprep.subr.bf16.mxu1 %v1070_v0 }
 0x17c   :  { %792 = vmatpush3.bf16.msra.mxu1 %v864_v51 }
 0x17d   :  { %793 = vmatprep.subr.bf16.mxu1 %v1070_v0 }
 0x180   :  { %794 = vmatpush3.bf16.msra.mxu1 %v865_v52 }
 0x181   :  { %795 = vmatprep.subr.bf16.mxu1 %v1070_v0 }
 0x184   :  { %796 = vmatpush3.bf16.msra.mxu1 %v866_v18 }
 0x185   :  { %797 = vmatprep.subr.bf16.mxu1 %v1070_v0 }
 0x188   :  { %798 = vmatpush3.bf16.msra.mxu1 %v867_v19 }
 0x23e   :  { %v384_v60 = vpop.f32.mrb[0].mxu1 }
 0x23f   :  { %v385_v61 = vadd.f32 %v384_v60, %v263_v58  ;;  %v386_v62 = vpop.f32.mrb[1].mxu1 }
 0x240   :  { %v387_v63 = vadd.f32 %v386_v62, %v267_v59  ;;  %v388_v1 = vpop.f32.mrb[2].mxu1 }
 0x241   :  { %633 = vst [vmem:[#allocation14] sm:$0xff] %v385_v61  ;;  %v389_v2 = vadd.f32 %v388_v1, %v263_v58  ;;  %v390_v3 = vpop.f32.mrb[3].mxu1 }
 0x242   :  { %v393_v4 = vmul.f32 0.5, %v387_v63  ;;  %634 = vst [vmem:[#allocation14 + $0x8] sm:$0xff] %v387_v63  ;;  %v391_v5 = vadd.f32 %v390_v3, %v267_v59 }
 0x243   :  { %635 = vst [vmem:[#allocation14 + $0x10] sm:$0xff] %v389_v2 }
 0x244   :  { %v395_v6 = vmul.f32 1.442695, %v393_v4  ;;  %v394_v7 = vmul.f32 0.5, %v391_v5  ;;  %636 = vst [vmem:[#allocation14 + $0x18] sm:$0xff] %v391_v5 }
 0x246   :  { %868 = vpow2.f32 %v395_v6  ;;  %v397_v8 = vmul.f32 1.442695, %v394_v7 }
 0x248   :  { %870 = vpow2.f32 %v397_v8 }
 0x250   :  { %v869_v10 = vpop.eup %868 }
 0x251   :  { %v399_v12 = vmul.f32 %v869_v10, %v125_v9 }
 0x252   :  { %v871_v13 = vpop.eup %870 }
 0x253   :  { %v400_v14 = vmul.f32 %v871_v13, %v126_v11  ;;  %v401_v15 = vadd.f32 %v399_v12, %v385_v61 }
 0x255   :  { %v402_v16 = vadd.f32 %v400_v14, %v389_v2 }
 0x257   :  { %v403_v17 = vpack.c.bf16 %v402_v16, %v401_v15 }
 0x259   :  { %780 = vmatmul.mubr.bf16.vlgmr.msra.gmra.mrb[4].mxu0 %v403_v17 }
 0x32c   :  { %v509_v21 = vpop.f32.mrb[4].mxu0 }
 0x32d   :  { %v510_v22 = vadd.f32 %v698_v20, %v509_v21  ;;  %v781_v23 = vpop.f32.mrb[5].mxu0 }
 0x32e   :  { %v512_v24 = vpop.f32.mrb[6].mxu0 }
 0x32f   :  { %v513_v25 = vadd.f32 %v698_v20, %v512_v24  ;;  %v782_v26 = vpop.f32.mrb[7].mxu0  ;;  %v516_v27 = vmax.f32 %v510_v22, 0.0 }
 0x331   :  { %v517_v28 = vmax.f32 %v513_v25, 0.0 }
 0x333   :  { %v518_v29 = vpack.c.bf16 %v517_v28, %v516_v27 }
 0x335   :  { %800 = vmatmul.mubr.bf16.vlgmr.msra.gmra.mrb[4].mxu1 %v518_v29 }
 0x336   :  { %1015 = shalt.err (!%p1012_p10)
}
 0x337   :  { %s1016_s23 = scalar_lea.hbm %s1328_s11, 512 }
 0x338   :  { %p1017_p11 = scmp.ne.s32.totalorder %s1328_s11, %s1016_s23  ;;  %p1020_p12 = scmp.lt.u32.totalorder %s1016_s23, %s1328_s11 }
 0x33a   :  { %p1022_p13 = pnand %p1020_p12, %p1017_p11 }
 0x33c   :  { %1025 = shalt.err (!%p1022_p13)
}
 0x33d   :  { %s1074_s24 = smov 256   ;;  %s1075_s26 = smov 16   ;;  %v707_v0 = vld [vmem:[%s1326_s9] ss:$0 sm:$0xff] }
 0x33e   :  { %660 = dma.vmem_to_hbm [thread:$0]  %s655_s19, 512, %s1328_s11, [#allocation15], %s1074_s24, %s1074_s24, %s1075_s26  }
 0x33f   :  { %s1076_s16 = smov [#allocation13]  }
 0x340   :  { %s642_s4 = sshll.u32 %s1076_s16, 4  ;;  %s643_s4 = int_to_ptr.vmem [resolvable:$true] %s642_s4 }
 0x341   :  { %s1026_s6 = scalar_lea.vmem %s643_s4, 256  ;;  %p1031_p1 = scmp.lt.s32.totalorder %s643_s4, %s643_s4 }
 0x342   :  { %p1027_p0 = scmp.ne.s32.totalorder %s643_s4, %s1026_s6  ;;  %p1032_p2 = scmp.lt.s32.totalorder %s1026_s6, %s1026_s6 }
 0x344   :  { %p1033_p3 = por %p1032_p2, %p1031_p1 }
 0x346   :  { %p1034_p4 = pnand %p1033_p3, %p1027_p0 }
 0x408   :  { %v624_v30 = vpop.f32.mrb[4].mxu1 }
 0x409   :  { %v625_v31 = vadd.f32 %v707_v0, %v624_v30  ;;  %v801_v32 = vpop.f32.mrb[5].mxu1 }
 0x40a   :  { %v627_v33 = vpop.f32.mrb[6].mxu1 }
 0x40b   :  { %631 = vst [vmem:[#allocation13] sm:$0xff] %v625_v31  ;;  %v628_v34 = vadd.f32 %v707_v0, %v627_v33  ;;  %v802_v35 = vpop.f32.mrb[7].mxu1 }
 0x40d   :  { %632 = vst [vmem:[#allocation13 + $0x8] sm:$0xff] %v628_v34 }
 0x40e   :  { %1037 = shalt.err (!%p1034_p4)
}
 0x40f   :  { %s1038_s15 = scalar_lea.hbm %s1327_s10, 256 }
 0x410   :  { %p1039_p5 = scmp.ne.s32.totalorder %s1327_s10, %s1038_s15  ;;  %p1042_p6 = scmp.lt.u32.totalorder %s1038_s15, %s1327_s10 }
 0x412   :  { %p1044_p7 = pnand %p1042_p6, %p1039_p5 }
 0x414   :  { %1047 = shalt.err (!%p1044_p7)
}
 0x415   :  { %648 = dma.vmem_to_hbm [thread:$0]  %s643_s4, 256, %s1327_s10, [#allocation4], %s1062_s29, %s1062_s29, %s1063_s30  }
 0x416   :  { %1056 = dma.done.wait [#allocation4], 256  }
 0x417   :  { %1057 = vsyncadd [#allocation4], 4294967040 }
 0x418   :  { %1058 = dma.done.wait [#allocation15], 512  }
 0x419   :  { %1059 = vsyncadd [#allocation15], 4294966784 }
 0x41a   :  { %667 = vsyncpa [#allocation3], 1 }
 0x41b   :  { %668 = vsyncpa [#allocation6], 1 }
 0x41c   :  { %669 = vsyncpa [#allocation9], 1 }
 0x41d   :  { %670 = vsyncpa [#allocation12], 1 }
 0x41e   :  { %671 = vsyncpa [#allocation4], 1 }
 0x41f   :  { %672 = vsyncpa [#allocation15], 1 }

</bundles_post_ra>
